<compile_context>
chip_gen: v7x
topology: tpu7x:2x2x1
jax: 0.10.0
libtpu: 0.0.40
codegen_flags: <defaults>
</compile_context>

<pallas_src>
import functools

import jax
import jax.numpy as jnp
from jax import lax
from jax.experimental import pallas as pl
from jax.experimental.pallas import tpu as pltpu

CIN = 1024        # F : embedding features
C1 = 32           # hidden channels
COUT = 20         # N : number of 3Di classes
KSIZE = 7
PAD = 3
XHALO = 2 * PAD   # combined x halo of the two stacked convs (6 rows each side)
XOFF = 8          # sublane-aligned front margin of the x window buffer (>= XHALO)
OFS = XOFF - XHALO  # first buffer row consumed by the tap recombination


def _round_up(x, m):
    return ((x + m - 1) // m) * m


def cnn_kernel(x_hbm, w1s_ref, b1_ref, w2s_ref, b2_ref, out_ref,
               xbuf, sem, *, L, TL, nL, inner):
    """grid = (G, inner); batch index = g*inner + i; the t loop tiles L.

    x_hbm   : (B, L, CIN)  HBM ref, native dtype, unpadded
    w1s_ref : (CIN, 7*C1)  bf16   conv1 weights, taps stacked along lanes
    b1_ref  : (1, C1)      f32
    w2s_ref : (7*C1, COUT) bf16   conv2 weights, taps stacked along sublanes
    b2_ref  : (1, COUT)    f32
    out_ref : (COUT, L)    f32    lane-dense output block for this batch elem
    xbuf    : (2, TL+16, CIN)     VMEM double buffer of overlapping x windows
    sem     : (2,) DMA semaphores
    """
    g = pl.program_id(0)
    i = pl.program_id(1)
    bidx = g * inner + i

    HW = TL + 2 * PAD          # hidden (conv1 output) rows needed per tile
    NRB = TL + 2 * XOFF        # x rows held per window buffer

    # Loop-invariant parameter loads (hoisted out of the unrolled t loop).
    w1v = w1s_ref[...]
    w2v = w2s_ref[...]
    b1v = b1_ref[...]
    b2v = b2_ref[...]

    # Buffer-slot parity over the flattened (i, t) step index of this group:
    # slot(step) = step % 2 with step = i*nL + t, so the DMA chain stays alive
    # across grid iterations (cross-batch prefetch).
    pb = 0 if nL % 2 == 0 else (i & 1)

    def copy_for(t, slot, bsel):
        # Window t covers x rows [t*TL - XOFF, t*TL - XOFF + NRB); rows outside
        # [0, L) are not transferred (masked to zero after the VMEM load).
        xlo = t * TL - XOFF
        s0 = max(xlo, 0)
        nv = min(xlo + NRB, L) - s0
        d0 = s0 - xlo                      # 8 for t == 0, else 0 (8-aligned)
        return pltpu.make_async_copy(
            x_hbm.at[bsel, pl.ds(s0, nv)],
            xbuf.at[slot, pl.ds(d0, nv)],
            sem.at[slot])

    # First window of this group's first batch; later batches have their first
    # window prefetched by the previous grid step.
    @pl.when(i == 0)
    def _():
        copy_for(0, 0, bidx).start()

    # TODO(synk): for very large nL convert this unrolled loop to lax.fori_loop
    # (peel first/last tiles, traced boundary masks) to bound code size.
    for t in range(nL):
        slot = pb ^ (t & 1)
        nslot = pb ^ ((t + 1) & 1)
        copy_for(t, slot, bidx).wait()

        # Keep the DMA chain busy: next tile of this batch, or the first tile
        # of the next batch in this group.
        if t + 1 < nL:
            copy_for(t + 1, nslot, bidx).start()
        else:
            @pl.when(i + 1 < inner)
            def _():
                copy_for(0, nslot, bidx + 1).start()

        # ---- conv1: one wide bf16 MXU matmul, f32 accumulation --------------
        xv = xbuf[slot]
        if xv.dtype != jnp.bfloat16:
            xv = xv.astype(jnp.bfloat16)
        xlo = t * TL - XOFF
        if xlo < 0 or xlo + NRB > L:           # boundary tiles only (static)
            ridx = lax.broadcasted_iota(jnp.int32, (NRB, 1), 0) + xlo
            xv = jnp.where((ridx >= 0) & (ridx < L), xv, 0)

        H = jnp.dot(xv, w1v, preferred_element_type=jnp.float32)    # (NRB, 7*C1)

        # recombine taps: h[m] = sum_k H[m + OFS + k, k*C1:(k+1)*C1] (tree add)
        parts = [H[k + OFS:k + OFS + HW, k * C1:(k + 1) * C1]
                 for k in range(KSIZE)]
        while len(parts) > 1:
            nxt = [parts[j] + parts[j + 1] for j in range(0, len(parts) - 1, 2)]
            if len(parts) % 2:
                nxt.append(parts[-1])
            parts = nxt
        h = jnp.maximum(parts[0] + b1v, 0.0)                        # (HW, C1)
        # Dropout(p=0.0) is the identity in the forward pass.

        # zero the conv2 halo rows that fall outside the valid sequence
        lo = t * TL - PAD                    # global h row of h[0]
        if lo < 0 or lo + HW > L:            # boundary tiles only (static)
            hidx = lax.broadcasted_iota(jnp.int32, (HW, 1), 0) + lo
            h = jnp.where((hidx >= 0) & (hidx < L), h, 0.0)

        # ---- conv2: im2col (lane concat of 7 shifted bf16 views) + matmul ---
        hb = h.astype(jnp.bfloat16)
        hcat = jnp.concatenate([hb[k:k + TL, :] for k in range(KSIZE)],
                               axis=-1)                             # (TL, 7*C1)
        y = jnp.dot(hcat, w2v, preferred_element_type=jnp.float32) + b2v

        # ---- lane-dense store: (COUT, tw) slab at lane offset t*TL ----------
        q0 = t * TL
        tw = min(TL, L - q0)
        yt = jnp.transpose(y)                                       # (COUT, TL)
        out_ref[:, q0:q0 + tw] = yt[:, :tw]


def cnn_forward(x, w1, b1, w2, b2, *, tile_l=1024):
    """x: (B, L, CIN) f32 or bf16 -> (B, COUT, L) f32 (matches PyTorch module).

    w1: (7, CIN, C1), b1: (C1,), w2: (7, C1, COUT), b2: (COUT,)
    (torch Conv2d weights (O, I, 7, 1) map to this layout via
     w[k, i, o] = conv.weight[o, i, k, 0].)
    """
    B, L, cin = x.shape
    assert cin == CIN
    TL = min(_round_up(tile_l, 8), _round_up(L, 8))   # sequence tile (mult of 8)
    nL = -(-L // TL)

    # Even batches are split into two groups (outer "parallel" axis) so both
    # v7x TensorCores get an independent DMA/compute chain; inner axis is
    # "arbitrary" so the cross-iteration DMA carry is legal.
    G = 2 if (B % 2 == 0 and B >= 2) else 1
    inner = B // G
    # TODO(synk): for B == 1 on v7x, additionally split the sequence tiles
    # across the two cores (disjoint output lane ranges) to avoid an idle core.

    w1s = jnp.transpose(w1, (1, 0, 2)).reshape(CIN, KSIZE * C1).astype(jnp.bfloat16)
    w2s = w2.reshape(KSIZE * C1, COUT).astype(jnp.bfloat16)
    b1r = b1.reshape(1, C1).astype(jnp.float32)
    b2r = b2.reshape(1, COUT).astype(jnp.float32)

    kernel = functools.partial(cnn_kernel, L=L, TL=TL, nL=nL, inner=inner)
    return pl.pallas_call(
        kernel,
        out_shape=jax.ShapeDtypeStruct((B, COUT, L), jnp.float32),
        grid_spec=pltpu.PrefetchScalarGridSpec(
            num_scalar_prefetch=0,
            grid=(G, inner),
            in_specs=[
                pl.BlockSpec(memory_space=pl.ANY),                     # x (HBM)
                pl.BlockSpec((CIN, KSIZE * C1), lambda g, i: (0, 0)),  # W1
                pl.BlockSpec((1, C1), lambda g, i: (0, 0)),            # b1
                pl.BlockSpec((KSIZE * C1, COUT), lambda g, i: (0, 0)), # W2
                pl.BlockSpec((1, COUT), lambda g, i: (0, 0)),          # b2
            ],
            out_specs=pl.BlockSpec((None, COUT, L),
                                   lambda g, i: (g * inner + i, 0, 0)),
            scratch_shapes=[
                pltpu.VMEM((2, TL + 2 * XOFF, CIN), x.dtype),   # x double buffer
                pltpu.SemaphoreType.DMA((2,)),
            ],
        ),
        compiler_params=pltpu.CompilerParams(
            dimension_semantics=("parallel", "arbitrary"),
            vmem_limit_bytes=48 * 1024 * 1024,
        ),
    )(x, w1s, b1r, w2s, b2r)


def reference_forward(x, w1, b1, w2, b2):
    """Independent f32 reference using lax.conv_general_dilated (NCH layout)."""
    x_nch = jnp.transpose(x.astype(jnp.float32), (0, 2, 1))       # (B, CIN, L)
    w1_oih = jnp.transpose(w1, (2, 1, 0))                         # (C1, CIN, 7)
    w2_oih = jnp.transpose(w2, (2, 1, 0))                         # (COUT, C1, 7)
    dn = lax.conv_dimension_numbers(x_nch.shape, w1_oih.shape, ("NCH", "OIH", "NCH"))
    h = lax.conv_general_dilated(x_nch, w1_oih, (1,), [(PAD, PAD)],
                                 dimension_numbers=dn,
                                 precision=lax.Precision.HIGHEST)
    h = jnp.maximum(h + b1.reshape(1, C1, 1), 0.0)
    dn2 = lax.conv_dimension_numbers(h.shape, w2_oih.shape, ("NCH", "OIH", "NCH"))
    y = lax.conv_general_dilated(h, w2_oih, (1,), [(PAD, PAD)],
                                 dimension_numbers=dn2,
                                 precision=lax.Precision.HIGHEST)
    return y + b2.reshape(1, COUT, 1)                             # (B, COUT, L)


if __name__ == "__main__":
    def run_case(B, L, tile_l):
        key = jax.random.PRNGKey(0)
        kx, kw1, kb1, kw2, kb2 = jax.random.split(key, 5)
        x = jax.random.normal(kx, (B, L, CIN), jnp.float32)
        w1 = jax.random.normal(kw1, (KSIZE, CIN, C1), jnp.float32) * 0.02
        b1 = jax.random.normal(kb1, (C1,), jnp.float32) * 0.02
        w2 = jax.random.normal(kw2, (KSIZE, C1, COUT), jnp.float32) * 0.05
        b2 = jax.random.normal(kb2, (COUT,), jnp.float32) * 0.05

        y = jax.block_until_ready(cnn_forward(x, w1, b1, w2, b2, tile_l=tile_l))
        y_ref = jax.block_until_ready(reference_forward(x, w1, b1, w2, b2))
        assert y.shape == (B, COUT, L), y.shape
        # bf16 matmul inputs with f32 accumulation -> loosened tolerance.
        err = jnp.max(jnp.abs(y - y_ref))
        assert jnp.allclose(y, y_ref, atol=3e-2, rtol=3e-2), (
            f"mismatch vs reference (B={B} L={L} tile_l={tile_l}, "
            f"max abs err {err})")

    run_case(B=2, L=16, tile_l=512)    # nL=1, G=2: two parallel groups
    run_case(B=4, L=40, tile_l=512)    # nL=1: cross-batch prefetch inside groups
    run_case(B=1, L=200, tile_l=128)   # nL=2: within-batch prefetch, partial tile
    run_case(B=3, L=100, tile_l=48)    # odd B, odd nL: traced slot-parity chain
    print("KERNEL_OK")
</pallas_src>

<mosaic_0001>
module attributes {stable_mosaic.version = 11 : i64} {
  func.func @cnn_kernel(%arg0: i32, %arg1: i32, %arg2: memref<2x16x1024xf32, #tpu.memory_space<any>>, %arg3: memref<1024x224xbf16, #tpu.memory_space<vmem>>, %arg4: memref<1x32xf32, #tpu.memory_space<vmem>>, %arg5: memref<224x20xbf16, #tpu.memory_space<vmem>>, %arg6: memref<1x20xf32, #tpu.memory_space<vmem>>, %arg7: memref<1x20x16xf32, #tpu.memory_space<vmem>>, %arg8: memref<2x32x1024xf32, #tpu.memory_space<vmem>>, %arg9: memref<2x!tpu.dma_semaphore, #tpu.memory_space<semaphore_mem>>) attributes {dimension_semantics = [#tpu.dimension_semantics<parallel>, #tpu.dimension_semantics<arbitrary>], iteration_bounds = array<i64: 2, 1>, scalar_prefetch = 0 : i64, scratch_operands = 2 : i64, tpu.core_type = #tpu.core_type<tc>, window_params = [{}, {pipeline_mode = #tpu.pipeline_mode<synchronous>, transform_indices = @transform_1, window_bounds = array<i64: 1024, 224>}, {pipeline_mode = #tpu.pipeline_mode<synchronous>, transform_indices = @transform_2, window_bounds = array<i64: 1, 32>}, {pipeline_mode = #tpu.pipeline_mode<synchronous>, transform_indices = @transform_3, window_bounds = array<i64: 224, 20>}, {pipeline_mode = #tpu.pipeline_mode<synchronous>, transform_indices = @transform_4, window_bounds = array<i64: 1, 20>}, {transform_indices = @transform_5, window_bounds = array<i64: 1, 20, 16>}]} {
    %c1_i32 = arith.constant 1 : i32
    %0 = arith.muli %arg0, %c1_i32 : i32
    %1 = arith.addi %0, %arg1 : i32
    %c0 = arith.constant 0 : index
    %c0_0 = arith.constant 0 : index
    %2 = vector.load %arg3[%c0, %c0_0] : memref<1024x224xbf16, #tpu.memory_space<vmem>>, vector<1024x224xbf16>
    %c0_1 = arith.constant 0 : index
    %c0_2 = arith.constant 0 : index
    %3 = vector.load %arg5[%c0_1, %c0_2] : memref<224x20xbf16, #tpu.memory_space<vmem>>, vector<224x20xbf16>
    %c0_3 = arith.constant 0 : index
    %c0_4 = arith.constant 0 : index
    %4 = vector.load %arg4[%c0_3, %c0_4] : memref<1x32xf32, #tpu.memory_space<vmem>>, vector<1x32xf32>
    %c0_5 = arith.constant 0 : index
    %c0_6 = arith.constant 0 : index
    %5 = vector.load %arg6[%c0_5, %c0_6] : memref<1x20xf32, #tpu.memory_space<vmem>>, vector<1x20xf32>
    %c1_i32_7 = arith.constant 1 : i32
    %6 = arith.andi %arg1, %c1_i32_7 : i32
    %c0_i32 = arith.constant 0 : i32
    %7 = arith.cmpi eq, %arg1, %c0_i32 : i32
    %8 = arith.extui %7 : i1 to i32
    %c0_i32_8 = arith.constant 0 : i32
    %9 = arith.cmpi ne, %8, %c0_i32_8 : i32
    scf.if %9 {
      %c0_i32_29 = arith.constant 0 : i32
      %c0_i32_30 = arith.constant 0 : i32
      %c0_i32_31 = arith.constant 0 : i32
      %c0_i32_32 = arith.constant 0 : i32
      %85 = tpu.memref_slice %arg2[%1, %c0_i32_31, %c0_i32_32] : memref<2x16x1024xf32, #tpu.memory_space<any>> -> memref<1x16x1024xf32, #tpu.memory_space<any>>
      %86 = tpu.memref_squeeze %85 : memref<1x16x1024xf32, #tpu.memory_space<any>> -> memref<16x1024xf32, #tpu.memory_space<any>>
      %c8_i32_33 = arith.constant 8 : i32
      %c0_i32_34 = arith.constant 0 : i32
      %87 = tpu.memref_slice %arg8[%c0_i32_29, %c8_i32_33, %c0_i32_34] : memref<2x32x1024xf32, #tpu.memory_space<vmem>> -> memref<1x16x1024xf32, #tpu.memory_space<vmem>>
      %88 = tpu.memref_squeeze %87 : memref<1x16x1024xf32, #tpu.memory_space<vmem>> -> memref<16x1024xf32, #tpu.memory_space<vmem>>
      %89 = tpu.memref_slice %arg9[%c0_i32_30] : memref<2x!tpu.dma_semaphore, #tpu.memory_space<semaphore_mem>> -> memref<1x!tpu.dma_semaphore, #tpu.memory_space<semaphore_mem>>
      %90 = tpu.memref_squeeze %89 : memref<1x!tpu.dma_semaphore, #tpu.memory_space<semaphore_mem>> -> memref<!tpu.dma_semaphore, #tpu.memory_space<semaphore_mem>>
      tpu.enqueue_dma source(%86 : memref<16x1024xf32, #tpu.memory_space<any>>) target(%88 : memref<16x1024xf32, #tpu.memory_space<vmem>>) target_semaphore(%90 : memref<!tpu.dma_semaphore, #tpu.memory_space<semaphore_mem>>)
    } else {
    }
    %c0_i32_9 = arith.constant 0 : i32
    %10 = arith.xori %6, %c0_i32_9 : i32
    %c1_i32_10 = arith.constant 1 : i32
    %11 = arith.xori %6, %c1_i32_10 : i32
    %c0_i32_11 = arith.constant 0 : i32
    %c0_i32_12 = arith.constant 0 : i32
    %12 = tpu.memref_slice %arg2[%1, %c0_i32_11, %c0_i32_12] : memref<2x16x1024xf32, #tpu.memory_space<any>> -> memref<1x16x1024xf32, #tpu.memory_space<any>>
    %13 = tpu.memref_squeeze %12 : memref<1x16x1024xf32, #tpu.memory_space<any>> -> memref<16x1024xf32, #tpu.memory_space<any>>
    %c8_i32 = arith.constant 8 : i32
    %c0_i32_13 = arith.constant 0 : i32
    %14 = tpu.memref_slice %arg8[%10, %c8_i32, %c0_i32_13] : memref<2x32x1024xf32, #tpu.memory_space<vmem>> -> memref<1x16x1024xf32, #tpu.memory_space<vmem>>
    %15 = tpu.memref_squeeze %14 : memref<1x16x1024xf32, #tpu.memory_space<vmem>> -> memref<16x1024xf32, #tpu.memory_space<vmem>>
    %16 = tpu.memref_slice %arg9[%10] : memref<2x!tpu.dma_semaphore, #tpu.memory_space<semaphore_mem>> -> memref<1x!tpu.dma_semaphore, #tpu.memory_space<semaphore_mem>>
    %17 = tpu.memref_squeeze %16 : memref<1x!tpu.dma_semaphore, #tpu.memory_space<semaphore_mem>> -> memref<!tpu.dma_semaphore, #tpu.memory_space<semaphore_mem>>
    tpu.wait_dma2 semaphore(%17 : memref<!tpu.dma_semaphore, #tpu.memory_space<semaphore_mem>>) src(%13 : memref<16x1024xf32, #tpu.memory_space<any>>) dst(%15 : memref<16x1024xf32, #tpu.memory_space<vmem>>)
    %c1_i32_14 = arith.constant 1 : i32
    %18 = arith.addi %arg1, %c1_i32_14 : i32
    %c1_i32_15 = arith.constant 1 : i32
    %19 = arith.cmpi slt, %18, %c1_i32_15 : i32
    %20 = arith.extui %19 : i1 to i32
    %c0_i32_16 = arith.constant 0 : i32
    %21 = arith.cmpi ne, %20, %c0_i32_16 : i32
    scf.if %21 {
      %c1_i32_29 = arith.constant 1 : i32
      %85 = arith.addi %1, %c1_i32_29 : i32
      %c0_i32_30 = arith.constant 0 : i32
      %c0_i32_31 = arith.constant 0 : i32
      %86 = tpu.memref_slice %arg2[%85, %c0_i32_30, %c0_i32_31] : memref<2x16x1024xf32, #tpu.memory_space<any>> -> memref<1x16x1024xf32, #tpu.memory_space<any>>
      %87 = tpu.memref_squeeze %86 : memref<1x16x1024xf32, #tpu.memory_space<any>> -> memref<16x1024xf32, #tpu.memory_space<any>>
      %c8_i32_32 = arith.constant 8 : i32
      %c0_i32_33 = arith.constant 0 : i32
      %88 = tpu.memref_slice %arg8[%11, %c8_i32_32, %c0_i32_33] : memref<2x32x1024xf32, #tpu.memory_space<vmem>> -> memref<1x16x1024xf32, #tpu.memory_space<vmem>>
      %89 = tpu.memref_squeeze %88 : memref<1x16x1024xf32, #tpu.memory_space<vmem>> -> memref<16x1024xf32, #tpu.memory_space<vmem>>
      %90 = tpu.memref_slice %arg9[%11] : memref<2x!tpu.dma_semaphore, #tpu.memory_space<semaphore_mem>> -> memref<1x!tpu.dma_semaphore, #tpu.memory_space<semaphore_mem>>
      %91 = tpu.memref_squeeze %90 : memref<1x!tpu.dma_semaphore, #tpu.memory_space<semaphore_mem>> -> memref<!tpu.dma_semaphore, #tpu.memory_space<semaphore_mem>>
      tpu.enqueue_dma source(%87 : memref<16x1024xf32, #tpu.memory_space<any>>) target(%89 : memref<16x1024xf32, #tpu.memory_space<vmem>>) target_semaphore(%91 : memref<!tpu.dma_semaphore, #tpu.memory_space<semaphore_mem>>)
    } else {
    }
    %22 = arith.index_cast %10 : i32 to index
    %c0_17 = arith.constant 0 : index
    %c0_18 = arith.constant 0 : index
    %23 = vector.load %arg8[%22, %c0_17, %c0_18] : memref<2x32x1024xf32, #tpu.memory_space<vmem>>, vector<1x32x1024xf32>
    %24 = vector.shape_cast %23 : vector<1x32x1024xf32> to vector<32x1024xf32>
    %25 = arith.truncf %24 : vector<32x1024xf32> to vector<32x1024xbf16>
    %26 = tpu.iota {dimensions = array<i32: 0>} : vector<32x1xi32>
    %c-8_i32 = arith.constant -8 : i32
    %27 = vector.broadcast %c-8_i32 : i32 to vector<32x1xi32>
    %28 = arith.addi %26, %27 : vector<32x1xi32>
    %c0_i32_19 = arith.constant 0 : i32
    %29 = vector.broadcast %c0_i32_19 : i32 to vector<32x1xi32>
    %30 = arith.cmpi sge, %28, %29 : vector<32x1xi32>
    %c16_i32 = arith.constant 16 : i32
    %31 = vector.broadcast %c16_i32 : i32 to vector<32x1xi32>
    %32 = arith.cmpi slt, %28, %31 : vector<32x1xi32>
    %33 = arith.andi %30, %32 : vector<32x1xi1>
    %c0_i32_20 = arith.constant 0 : i32
    %34 = arith.sitofp %c0_i32_20 : i32 to bf16
    %35 = vector.shape_cast %33 : vector<32x1xi1> to vector<32x1xi1>
    %36 = vector.broadcast %35 : vector<32x1xi1> to vector<32x1024xi1>
    %37 = vector.broadcast %34 : bf16 to vector<32x1024xbf16>
    %38 = arith.select %36, %25, %37 : vector<32x1024xi1>, vector<32x1024xbf16>
    %cst = arith.constant dense<0.000000e+00> : vector<32x224xf32>
    %39 = tpu.matmul %38, %2, %cst {dimension_numbers = #tpu.dot_dimension_numbers<[1], [0], [0], [1], [0, 0, 1, 1], [], []>} : vector<32x1024xbf16>, vector<1024x224xbf16>, vector<32x224xf32> -> vector<32x224xf32>
    %40 = vector.extract_strided_slice %39 {offsets = [2, 0], sizes = [22, 32], strides = [1, 1]} : vector<32x224xf32> to vector<22x32xf32>
    %41 = vector.extract_strided_slice %39 {offsets = [3, 32], sizes = [22, 32], strides = [1, 1]} : vector<32x224xf32> to vector<22x32xf32>
    %42 = vector.extract_strided_slice %39 {offsets = [4, 64], sizes = [22, 32], strides = [1, 1]} : vector<32x224xf32> to vector<22x32xf32>
    %43 = vector.extract_strided_slice %39 {offsets = [5, 96], sizes = [22, 32], strides = [1, 1]} : vector<32x224xf32> to vector<22x32xf32>
    %44 = vector.extract_strided_slice %39 {offsets = [6, 128], sizes = [22, 32], strides = [1, 1]} : vector<32x224xf32> to vector<22x32xf32>
    %45 = vector.extract_strided_slice %39 {offsets = [7, 160], sizes = [22, 32], strides = [1, 1]} : vector<32x224xf32> to vector<22x32xf32>
    %46 = vector.extract_strided_slice %39 {offsets = [8, 192], sizes = [22, 32], strides = [1, 1]} : vector<32x224xf32> to vector<22x32xf32>
    %47 = arith.addf %40, %41 : vector<22x32xf32>
    %48 = arith.addf %42, %43 : vector<22x32xf32>
    %49 = arith.addf %44, %45 : vector<22x32xf32>
    %50 = arith.addf %47, %48 : vector<22x32xf32>
    %51 = arith.addf %49, %46 : vector<22x32xf32>
    %52 = arith.addf %50, %51 : vector<22x32xf32>
    %53 = vector.broadcast %4 : vector<1x32xf32> to vector<22x32xf32>
    %54 = arith.addf %52, %53 : vector<22x32xf32>
    %cst_21 = arith.constant 0.000000e+00 : f32
    %55 = vector.broadcast %cst_21 : f32 to vector<22x32xf32>
    %56 = arith.maximumf %54, %55 : vector<22x32xf32>
    %57 = tpu.iota {dimensions = array<i32: 0>} : vector<22x1xi32>
    %c-3_i32 = arith.constant -3 : i32
    %58 = vector.broadcast %c-3_i32 : i32 to vector<22x1xi32>
    %59 = arith.addi %57, %58 : vector<22x1xi32>
    %c0_i32_22 = arith.constant 0 : i32
    %60 = vector.broadcast %c0_i32_22 : i32 to vector<22x1xi32>
    %61 = arith.cmpi sge, %59, %60 : vector<22x1xi32>
    %c16_i32_23 = arith.constant 16 : i32
    %62 = vector.broadcast %c16_i32_23 : i32 to vector<22x1xi32>
    %63 = arith.cmpi slt, %59, %62 : vector<22x1xi32>
    %64 = arith.andi %61, %63 : vector<22x1xi1>
    %cst_24 = arith.constant 0.000000e+00 : f32
    %65 = vector.shape_cast %64 : vector<22x1xi1> to vector<22x1xi1>
    %66 = vector.broadcast %65 : vector<22x1xi1> to vector<22x32xi1>
    %67 = vector.broadcast %cst_24 : f32 to vector<22x32xf32>
    %68 = arith.select %66, %56, %67 : vector<22x32xi1>, vector<22x32xf32>
    %69 = arith.truncf %68 : vector<22x32xf32> to vector<22x32xbf16>
    %70 = vector.extract_strided_slice %69 {offsets = [0, 0], sizes = [16, 32], strides = [1, 1]} : vector<22x32xbf16> to vector<16x32xbf16>
    %71 = vector.extract_strided_slice %69 {offsets = [1, 0], sizes = [16, 32], strides = [1, 1]} : vector<22x32xbf16> to vector<16x32xbf16>
    %72 = vector.extract_strided_slice %69 {offsets = [2, 0], sizes = [16, 32], strides = [1, 1]} : vector<22x32xbf16> to vector<16x32xbf16>
    %73 = vector.extract_strided_slice %69 {offsets = [3, 0], sizes = [16, 32], strides = [1, 1]} : vector<22x32xbf16> to vector<16x32xbf16>
    %74 = vector.extract_strided_slice %69 {offsets = [4, 0], sizes = [16, 32], strides = [1, 1]} : vector<22x32xbf16> to vector<16x32xbf16>
    %75 = vector.extract_strided_slice %69 {offsets = [5, 0], sizes = [16, 32], strides = [1, 1]} : vector<22x32xbf16> to vector<16x32xbf16>
    %76 = vector.extract_strided_slice %69 {offsets = [6, 0], sizes = [16, 32], strides = [1, 1]} : vector<22x32xbf16> to vector<16x32xbf16>
    %77 = tpu.concatenate %70, %71, %72, %73, %74, %75, %76 in 1 : vector<16x32xbf16>, vector<16x32xbf16>, vector<16x32xbf16>, vector<16x32xbf16>, vector<16x32xbf16>, vector<16x32xbf16>, vector<16x32xbf16> -> vector<16x224xbf16>
    %cst_25 = arith.constant dense<0.000000e+00> : vector<16x20xf32>
    %78 = tpu.matmul %77, %3, %cst_25 {dimension_numbers = #tpu.dot_dimension_numbers<[1], [0], [0], [1], [0, 0, 1, 1], [], []>} : vector<16x224xbf16>, vector<224x20xbf16>, vector<16x20xf32> -> vector<16x20xf32>
    %79 = vector.broadcast %5 : vector<1x20xf32> to vector<16x20xf32>
    %80 = arith.addf %78, %79 : vector<16x20xf32>
    %81 = tpu.transpose %80, [1, 0] : vector<16x20xf32> -> vector<20x16xf32>
    %c0_26 = arith.constant 0 : index
    %c0_27 = arith.constant 0 : index
    %c0_28 = arith.constant 0 : index
    %82 = vector.load %arg7[%c0_26, %c0_27, %c0_28] : memref<1x20x16xf32, #tpu.memory_space<vmem>>, vector<1x20x16xf32>
    %83 = vector.shape_cast %82 : vector<1x20x16xf32> to vector<20x16xf32>
    %84 = vector.shape_cast %81 : vector<20x16xf32> to vector<1x20x16xf32>
    tpu.vector_store %arg7[%c0_26, %c0_27, %c0_28], %84 {strides = array<i32>} : memref<1x20x16xf32, #tpu.memory_space<vmem>>, vector<1x20x16xf32>,
    return
  }
  func.func @transform_1(%arg0: i32, %arg1: i32) -> (i32, i32) {
    %c0_i32 = arith.constant 0 : i32
    %c0_i32_0 = arith.constant 0 : i32
    %c0_i32_1 = arith.constant 0 : i32
    return %c0_i32, %c0_i32_0 : i32, i32
  }
  func.func @transform_2(%arg0: i32, %arg1: i32) -> (i32, i32) {
    %c0_i32 = arith.constant 0 : i32
    %c0_i32_0 = arith.constant 0 : i32
    %c0_i32_1 = arith.constant 0 : i32
    return %c0_i32, %c0_i32_0 : i32, i32
  }
  func.func @transform_3(%arg0: i32, %arg1: i32) -> (i32, i32) {
    %c0_i32 = arith.constant 0 : i32
    %c0_i32_0 = arith.constant 0 : i32
    %c0_i32_1 = arith.constant 0 : i32
    return %c0_i32, %c0_i32_0 : i32, i32
  }
  func.func @transform_4(%arg0: i32, %arg1: i32) -> (i32, i32) {
    %c0_i32 = arith.constant 0 : i32
    %c0_i32_0 = arith.constant 0 : i32
    %c0_i32_1 = arith.constant 0 : i32
    return %c0_i32, %c0_i32_0 : i32, i32
  }
  func.func @transform_5(%arg0: i32, %arg1: i32) -> (i32, i32, i32) {
    %c1_i32 = arith.constant 1 : i32
    %0 = arith.muli %arg0, %c1_i32 : i32
    %1 = arith.addi %0, %arg1 : i32
    %c0_i32 = arith.constant 0 : i32
    %c0_i32_0 = arith.constant 0 : i32
    %c0_i32_1 = arith.constant 0 : i32
    return %1, %c0_i32, %c0_i32_0 : i32, i32, i32
  }
}

</mosaic_0001>

<bundles_post_ra>
// kernel: tpu_custom_call.1
= control target key start
LH: loop header
LB: loop body
LE: loop exit
PB: predicated region body
PF: predicated region fallthrough
CT: control target
= control target key end

     0   :  { %s2327_s18 = smov 0   ;;  %s2329_s19 = smov 0   ;;  %s3599_s0 = inlined_call_operand.vmem [shape: f32[2,16,1024], index: 0, kind: input, shape index: {}]   ;;  %s3600_s1 = inlined_call_operand.vmem [shape: bf16[1024,224], index: 1, kind: input, shape index: {}]   ;;  %s3601_s2 = inlined_call_operand.vmem [shape: f32[1,32], index: 2, kind: input, shape index: {}]   ;;  %s3602_s3 = inlined_call_operand.vmem [shape: bf16[224,20], index: 3, kind: input, shape index: {}]   ;;  %s3603_s4 = inlined_call_operand.vmem [shape: f32[1,20], index: 4, kind: input, shape index: {}]   ;;  %s3604_s5 = inlined_call_operand.vmem [shape: f32[2,20,16], index: 5, kind: output, shape index: {}]  }
   0x1   :  { %s2331_s20 = smov 0  }
   0x2 LB: > { %s27_s21 = sadd.s32 1, %s2285_s19  ;;  %p2001_p0 = scmp.ge.s32.totalorder %s2289_s20, 1  ;;  %s2289_s20 = sphi %s2331_s20, %s15_s20   ;;  %s2285_s19 = sphi %s2329_s19, %s3900_s19   ;;  %s2281_s18 = sphi %s2327_s18, %s3899_s18  }
   0x3   : > { %p29_p1 = scmp.ge.s32.totalorder %s27_s21, 2  ;;  %p167_p2 = scmp.lt.s32.totalorder %s2289_s20, 3 }
   0x5   : > { %s3902_s21 = smov (%p29_p1, %s27_s21), 0  ;;  %p168_p3 = pnand %p2001_p0, %p167_p2 }
   0x7   : > { %171 = sbr.rel (%p168_p3) target bundleno = 1183 (0x49f), region = 36 }
   0xe   : > { %p190_p4 = scmp.lt.s32.totalorder %s2281_s18, 1  ;;  %v2351_v0 = vld [vmem:[%s3600_s1] sm:$0xff]  ;;  %v2356_v1 = vld [vmem:[%s3600_s1 + $0x8] sm:$0xff]  ;;  %v2361_v2 = vld [vmem:[%s3600_s1 + $0x10] sm:$0xff]  ;;  %s2208_s23 = sshll.u32 %s2281_s18, 7 }
   0xf   : > { %v2366_v3 = vld [vmem:[%s3600_s1 + $0x18] sm:$0xff]  ;;  %v2371_v4 = vld [vmem:[%s3600_s1 + $0x20] sm:$0xff]  ;;  %v2376_v5 = vld [vmem:[%s3600_s1 + $0x28] sm:$0xff]  ;;  %s3108_s29 = scalar_lea.vmem %s3599_s0, %s2208_s23 }
  0x10   : > { %s191_s9 = scalar_select %p190_p4, %s2281_s18, 1  ;;  %v2382_v6 = vld [vmem:[%s3600_s1 + $0x30] sm:$0xff]  ;;  %v2387_v7 = vld [vmem:[%s3600_s1 + $0x38] sm:$0xff]  ;;  %v2392_v8 = vld [vmem:[%s3600_s1 + $0x40] sm:$0xff] }
  0x11   : > { %v2397_v9 = vld [vmem:[%s3600_s1 + $0x48] sm:$0xff]  ;;  %v2402_v10 = vld [vmem:[%s3600_s1 + $0x50] sm:$0xff]  ;;  %v2407_v11 = vld [vmem:[%s3600_s1 + $0x58] sm:$0xff] }
  0x12   : > { %s2233_s26 = smul.u32 24, %s191_s9  ;;  %v2412_v12 = vld [vmem:[%s3600_s1 + $0x60] sm:$0xff]  ;;  %v2417_v13 = vld [vmem:[%s3600_s1 + $0x68] sm:$0xff]  ;;  %v2422_v14 = vld [vmem:[%s3600_s1 + $0x70] sm:$0xff] }
  0x13   : > { %v2427_v15 = vld [vmem:[%s3600_s1 + $0x78] sm:$0xff]  ;;  %v2432_v16 = vld [vmem:[%s3600_s1 + $0x80] sm:$0xff]  ;;  %v2437_v17 = vld [vmem:[%s3600_s1 + $0x88] sm:$0xff] }
  0x14   : > { %s2442_s16 = scalar_lea.vmem %s3604_s5, %s2233_s26  ;;  %v2447_v18 = vld [vmem:[%s3600_s1 + $0x90] sm:$0xff]  ;;  %v2452_v19 = vld [vmem:[%s3600_s1 + $0x98] sm:$0xff]  ;;  %v2457_v20 = vld [vmem:[%s3600_s1 + $0xa0] sm:$0xff] }
  0x15   : > { %v2462_v21 = vld [vmem:[%s3600_s1 + $0xa8] sm:$0xff]  ;;  %v2467_v22 = vld [vmem:[%s3600_s1 + $0xb0] sm:$0xff]  ;;  %v2472_v23 = vld [vmem:[%s3600_s1 + $0xb8] sm:$0xff] }
  0x16   : > { %v2477_v24 = vld [vmem:[%s3600_s1 + $0xc0] sm:$0xff]  ;;  %v2482_v25 = vld [vmem:[%s3600_s1 + $0xc8] sm:$0xff]  ;;  %v2487_v26 = vld [vmem:[%s3600_s1 + $0xd0] sm:$0xff] }
  0x17   : > { %3683 = vst [vmem:[#allocation7_spill] sm:$0xff] %v2487_v26  ;;  %v2492_v27 = vld [vmem:[%s3600_s1 + $0xd8] sm:$0xff]  ;;  %v2497_v28 = vld [vmem:[%s3600_s1 + $0xe0] sm:$0xff]  ;;  %v2502_v29 = vld [vmem:[%s3600_s1 + $0xe8] sm:$0xff] }
  0x18   : > { %3684 = vst [vmem:[#allocation8_spill] sm:$0xff] %v2492_v27  ;;  %3685 = vst [vmem:[#allocation9_spill] sm:$0xff] %v2497_v28  ;;  %v2507_v30 = vld [vmem:[%s3600_s1 + $0xf0] sm:$0xff]  ;;  %v2512_v31 = vld [vmem:[%s3600_s1 + $0xf8] sm:$0xff] }
  0x19   : > { %3686 = vst [vmem:[#allocation10_spill] sm:$0xff] %v2502_v29  ;;  %3687 = vst [vmem:[#allocation11_spill] sm:$0xff] %v2507_v30  ;;  %v2517_v32 = vld [vmem:[%s3600_s1 + $0x100] sm:$0xff]  ;;  %v2522_v33 = vld [vmem:[%s3600_s1 + $0x108] sm:$0xff] }
  0x1a   : > { %3688 = vst [vmem:[#allocation12_spill] sm:$0xff] %v2512_v31  ;;  %3689 = vst [vmem:[#allocation13_spill] sm:$0xff] %v2517_v32  ;;  %v2527_v34 = vld [vmem:[%s3600_s1 + $0x110] sm:$0xff]  ;;  %v2532_v35 = vld [vmem:[%s3600_s1 + $0x118] sm:$0xff] }
  0x1b   : > { %3690 = vst [vmem:[#allocation14_spill] sm:$0xff] %v2522_v33  ;;  %3691 = vst [vmem:[#allocation15_spill] sm:$0xff] %v2527_v34  ;;  %v2537_v36 = vld [vmem:[%s3600_s1 + $0x120] sm:$0xff]  ;;  %v2542_v37 = vld [vmem:[%s3600_s1 + $0x128] sm:$0xff] }
  0x1c   : > { %3692 = vst [vmem:[#allocation16_spill] sm:$0xff] %v2532_v35  ;;  %3693 = vst [vmem:[#allocation17_spill] sm:$0xff] %v2537_v36  ;;  %v2547_v38 = vld [vmem:[%s3600_s1 + $0x130] sm:$0xff]  ;;  %v2552_v39 = vld [vmem:[%s3600_s1 + $0x138] sm:$0xff] }
  0x1d   : > { %3694 = vst [vmem:[#allocation18_spill] sm:$0xff] %v2542_v37  ;;  %3695 = vst [vmem:[#allocation19_spill] sm:$0xff] %v2547_v38  ;;  %v2557_v40 = vld [vmem:[%s3600_s1 + $0x140] sm:$0xff]  ;;  %v2562_v41 = vld [vmem:[%s3600_s1 + $0x148] sm:$0xff] }
  0x1e   : > { %3696 = vst [vmem:[#allocation20_spill] sm:$0xff] %v2552_v39  ;;  %3697 = vst [vmem:[#allocation21_spill] sm:$0xff] %v2557_v40  ;;  %v2567_v42 = vld [vmem:[%s3600_s1 + $0x150] sm:$0xff]  ;;  %v2572_v43 = vld [vmem:[%s3600_s1 + $0x158] sm:$0xff] }
  0x1f   : > { %3698 = vst [vmem:[#allocation22_spill] sm:$0xff] %v2562_v41  ;;  %3699 = vst [vmem:[#allocation23_spill] sm:$0xff] %v2567_v42  ;;  %v2577_v44 = vld [vmem:[%s3600_s1 + $0x160] sm:$0xff]  ;;  %v2582_v45 = vld [vmem:[%s3600_s1 + $0x168] sm:$0xff] }
  0x20   : > { %3700 = vst [vmem:[#allocation24_spill] sm:$0xff] %v2572_v43  ;;  %3701 = vst [vmem:[#allocation25_spill] sm:$0xff] %v2577_v44  ;;  %v2587_v46 = vld [vmem:[%s3600_s1 + $0x170] sm:$0xff]  ;;  %v2592_v47 = vld [vmem:[%s3600_s1 + $0x178] sm:$0xff] }
  0x21   : > { %3702 = vst [vmem:[#allocation26_spill] sm:$0xff] %v2582_v45  ;;  %3703 = vst [vmem:[#allocation27_spill] sm:$0xff] %v2587_v46  ;;  %v2597_v48 = vld [vmem:[%s3600_s1 + $0x180] sm:$0xff]  ;;  %v2602_v49 = vld [vmem:[%s3600_s1 + $0x188] sm:$0xff] }
  0x22   : > { %3704 = vst [vmem:[#allocation28_spill] sm:$0xff] %v2592_v47  ;;  %3705 = vst [vmem:[#allocation29_spill] sm:$0xff] %v2597_v48  ;;  %v2607_v50 = vld [vmem:[%s3600_s1 + $0x190] sm:$0xff]  ;;  %v2612_v51 = vld [vmem:[%s3600_s1 + $0x198] sm:$0xff] }
  0x23   : > { %3706 = vst [vmem:[#allocation30_spill] sm:$0xff] %v2602_v49  ;;  %3707 = vst [vmem:[#allocation31_spill] sm:$0xff] %v2607_v50  ;;  %v2617_v52 = vld [vmem:[%s3600_s1 + $0x1a0] sm:$0xff]  ;;  %v2622_v53 = vld [vmem:[%s3600_s1 + $0x1a8] sm:$0xff] }
  0x24   : > { %3708 = vst [vmem:[#allocation32_spill] sm:$0xff] %v2612_v51  ;;  %3709 = vst [vmem:[#allocation33_spill] sm:$0xff] %v2617_v52  ;;  %v2627_v54 = vld [vmem:[%s3600_s1 + $0x1b0] sm:$0xff]  ;;  %v2632_v55 = vld [vmem:[%s3600_s1 + $0x1b8] sm:$0xff] }
  0x25   : > { %3710 = vst [vmem:[#allocation34_spill] sm:$0xff] %v2622_v53  ;;  %3711 = vst [vmem:[#allocation35_spill] sm:$0xff] %v2627_v54  ;;  %v2637_v56 = vld [vmem:[%s3600_s1 + $0x1c0] sm:$0xff]  ;;  %v2642_v57 = vld [vmem:[%s3600_s1 + $0x1c8] sm:$0xff] }
  0x26   : > { %3712 = vst [vmem:[#allocation36_spill] sm:$0xff] %v2632_v55  ;;  %3713 = vst [vmem:[#allocation37_spill] sm:$0xff] %v2637_v56  ;;  %v2647_v58 = vld [vmem:[%s3600_s1 + $0x1d0] sm:$0xff]  ;;  %v2652_v59 = vld [vmem:[%s3600_s1 + $0x1d8] sm:$0xff] }
  0x27   : > { %3714 = vst [vmem:[#allocation38_spill] sm:$0xff] %v2642_v57  ;;  %3715 = vst [vmem:[#allocation39_spill] sm:$0xff] %v2647_v58  ;;  %v2657_v60 = vld [vmem:[%s3600_s1 + $0x1e0] sm:$0xff]  ;;  %v2662_v61 = vld [vmem:[%s3600_s1 + $0x1e8] sm:$0xff] }
  0x28   : > { %3716 = vst [vmem:[#allocation40_spill] sm:$0xff] %v2652_v59  ;;  %3717 = vst [vmem:[#allocation41_spill] sm:$0xff] %v2657_v60  ;;  %v2667_v62 = vld [vmem:[%s3600_s1 + $0x1f0] sm:$0xff]  ;;  %v2672_v63 = vld [vmem:[%s3600_s1 + $0x1f8] sm:$0xff] }
  0x29   : > { %3718 = vst [vmem:[#allocation42_spill] sm:$0xff] %v2662_v61  ;;  %3719 = vst [vmem:[#allocation43_spill] sm:$0xff] %v2667_v62  ;;  %v2677_v58 = vld [vmem:[%s3600_s1 + $0x200] sm:$0xff]  ;;  %v2682_v60 = vld [vmem:[%s3600_s1 + $0x208] sm:$0xff] }
  0x2a   : > { %3720 = vst [vmem:[#allocation44_spill] sm:$0xff] %v2672_v63  ;;  %v2687_v61 = vld [vmem:[%s3600_s1 + $0x210] sm:$0xff]  ;;  %v2692_v62 = vld [vmem:[%s3600_s1 + $0x218] sm:$0xff]  ;;  %v2697_v63 = vld [vmem:[%s3600_s1 + $0x220] sm:$0xff] }
  0x2b   : > { %v2702_v59 = vld [vmem:[%s3600_s1 + $0x228] sm:$0xff]  ;;  %v2707_v56 = vld [vmem:[%s3600_s1 + $0x230] sm:$0xff]  ;;  %v2712_v57 = vld [vmem:[%s3600_s1 + $0x238] sm:$0xff] }
  0x2c   : > { %v2717_v54 = vld [vmem:[%s3600_s1 + $0x240] sm:$0xff]  ;;  %v2722_v55 = vld [vmem:[%s3600_s1 + $0x248] sm:$0xff]  ;;  %v2727_v52 = vld [vmem:[%s3600_s1 + $0x250] sm:$0xff] }
  0x2d   : > { %v2732_v53 = vld [vmem:[%s3600_s1 + $0x258] sm:$0xff]  ;;  %v2737_v50 = vld [vmem:[%s3600_s1 + $0x260] sm:$0xff]  ;;  %v2742_v51 = vld [vmem:[%s3600_s1 + $0x268] sm:$0xff] }
  0x2e   : > { %v2747_v48 = vld [vmem:[%s3600_s1 + $0x270] sm:$0xff]  ;;  %v2752_v49 = vld [vmem:[%s3600_s1 + $0x278] sm:$0xff]  ;;  %v2757_v46 = vld [vmem:[%s3600_s1 + $0x280] sm:$0xff] }
  0x2f   : > { %v2762_v47 = vld [vmem:[%s3600_s1 + $0x288] sm:$0xff]  ;;  %v2767_v44 = vld [vmem:[%s3600_s1 + $0x290] sm:$0xff]  ;;  %v2772_v45 = vld [vmem:[%s3600_s1 + $0x298] sm:$0xff] }
  0x30   : > { %v2777_v42 = vld [vmem:[%s3600_s1 + $0x2a0] sm:$0xff]  ;;  %v2782_v43 = vld [vmem:[%s3600_s1 + $0x2a8] sm:$0xff]  ;;  %v2787_v40 = vld [vmem:[%s3600_s1 + $0x2b0] sm:$0xff] }
  0x31   : > { %v2792_v41 = vld [vmem:[%s3600_s1 + $0x2b8] sm:$0xff]  ;;  %v2797_v38 = vld [vmem:[%s3600_s1 + $0x2c0] sm:$0xff]  ;;  %v2802_v39 = vld [vmem:[%s3600_s1 + $0x2c8] sm:$0xff] }
  0x32   : > { %v2807_v36 = vld [vmem:[%s3600_s1 + $0x2d0] sm:$0xff]  ;;  %v2812_v37 = vld [vmem:[%s3600_s1 + $0x2d8] sm:$0xff]  ;;  %v2817_v34 = vld [vmem:[%s3600_s1 + $0x2e0] sm:$0xff] }
  0x33   : > { %3721 = vst [vmem:[#allocation45_spill] sm:$0xff] %v2807_v36  ;;  %3722 = vst [vmem:[#allocation46_spill] sm:$0xff] %v2812_v37  ;;  %v2822_v35 = vld [vmem:[%s3600_s1 + $0x2e8] sm:$0xff]  ;;  %v2827_v32 = vld [vmem:[%s3600_s1 + $0x2f0] sm:$0xff] }
  0x34   : > { %3723 = vst [vmem:[#allocation47_spill] sm:$0xff] %v2817_v34  ;;  %3724 = vst [vmem:[#allocation48_spill] sm:$0xff] %v2822_v35  ;;  %v2832_v33 = vld [vmem:[%s3600_s1 + $0x2f8] sm:$0xff]  ;;  %v2837_v30 = vld [vmem:[%s3600_s1 + $0x300] sm:$0xff] }
  0x35   : > { %3725 = vst [vmem:[#allocation49_spill] sm:$0xff] %v2827_v32  ;;  %3726 = vst [vmem:[#allocation50_spill] sm:$0xff] %v2832_v33  ;;  %v2842_v31 = vld [vmem:[%s3600_s1 + $0x308] sm:$0xff]  ;;  %v2847_v34 = vld [vmem:[%s3600_s1 + $0x310] sm:$0xff] }
  0x36   : > { %3727 = vst [vmem:[#allocation51_spill] sm:$0xff] %v2837_v30  ;;  %3728 = vst [vmem:[#allocation52_spill] sm:$0xff] %v2842_v31  ;;  %v2852_v32 = vld [vmem:[%s3600_s1 + $0x318] sm:$0xff]  ;;  %v2857_v33 = vld [vmem:[%s3600_s1 + $0x320] sm:$0xff] }
  0x37   : > { %3729 = vst [vmem:[#allocation53_spill] sm:$0xff] %v2847_v34  ;;  %3730 = vst [vmem:[#allocation54_spill] sm:$0xff] %v2852_v32  ;;  %v2862_v30 = vld [vmem:[%s3600_s1 + $0x328] sm:$0xff]  ;;  %v2867_v31 = vld [vmem:[%s3600_s1 + $0x330] sm:$0xff] }
  0x38   : > { %3731 = vst [vmem:[#allocation55_spill] sm:$0xff] %v2857_v33  ;;  %3732 = vst [vmem:[#allocation56_spill] sm:$0xff] %v2862_v30  ;;  %v2872_v34 = vld [vmem:[%s3600_s1 + $0x338] sm:$0xff]  ;;  %v2877_v32 = vld [vmem:[%s3600_s1 + $0x340] sm:$0xff] }
  0x39   : > { %3733 = vst [vmem:[#allocation57_spill] sm:$0xff] %v2867_v31  ;;  %3734 = vst [vmem:[#allocation58_spill] sm:$0xff] %v2872_v34  ;;  %v2882_v33 = vld [vmem:[%s3600_s1 + $0x348] sm:$0xff]  ;;  %v2887_v30 = vld [vmem:[%s3600_s1 + $0x350] sm:$0xff] }
  0x3a   : > { %3735 = vst [vmem:[#allocation59_spill] sm:$0xff] %v2877_v32  ;;  %3736 = vst [vmem:[#allocation60_spill] sm:$0xff] %v2882_v33  ;;  %v2892_v31 = vld [vmem:[%s3600_s1 + $0x358] sm:$0xff]  ;;  %v2897_v34 = vld [vmem:[%s3600_s1 + $0x360] sm:$0xff] }
  0x3b   : > { %3737 = vst [vmem:[#allocation61_spill] sm:$0xff] %v2887_v30  ;;  %3738 = vst [vmem:[#allocation62_spill] sm:$0xff] %v2892_v31  ;;  %v2902_v32 = vld [vmem:[%s3600_s1 + $0x368] sm:$0xff]  ;;  %v2907_v33 = vld [vmem:[%s3600_s1 + $0x370] sm:$0xff] }
  0x3c   : > { %3739 = vst [vmem:[#allocation63_spill] sm:$0xff] %v2897_v34  ;;  %3740 = vst [vmem:[#allocation64_spill] sm:$0xff] %v2902_v32  ;;  %v2912_v30 = vld [vmem:[%s3600_s1 + $0x378] sm:$0xff]  ;;  %v2917_v31 = vld [vmem:[%s3600_s1 + $0x380] sm:$0xff] }
  0x3d   : > { %3741 = vst [vmem:[#allocation65_spill] sm:$0xff] %v2907_v33  ;;  %3742 = vst [vmem:[#allocation66_spill] sm:$0xff] %v2912_v30  ;;  %v2922_v34 = vld [vmem:[%s3600_s1 + $0x388] sm:$0xff]  ;;  %v2927_v33 = vld [vmem:[%s3600_s1 + $0x390] sm:$0xff] }
  0x3e   : > { %3743 = vst [vmem:[#allocation67_spill] sm:$0xff] %v2917_v31  ;;  %3744 = vst [vmem:[#allocation68_spill] sm:$0xff] %v2922_v34  ;;  %v2932_v30 = vld [vmem:[%s3600_s1 + $0x398] sm:$0xff]  ;;  %v2937_v31 = vld [vmem:[%s3600_s1 + $0x3a0] sm:$0xff] }
  0x3f   : > { %3745 = vst [vmem:[#allocation69_spill] sm:$0xff] %v2927_v33  ;;  %3746 = vst [vmem:[#allocation70_spill] sm:$0xff] %v2932_v30  ;;  %v2942_v34 = vld [vmem:[%s3600_s1 + $0x3a8] sm:$0xff]  ;;  %v2947_v32 = vld [vmem:[%s3600_s1 + $0x3b0] sm:$0xff] }
  0x40   : > { %3747 = vst [vmem:[#allocation71_spill] sm:$0xff] %v2937_v31  ;;  %3748 = vst [vmem:[#allocation72_spill] sm:$0xff] %v2942_v34  ;;  %v2952_v33 = vld [vmem:[%s3600_s1 + $0x3b8] sm:$0xff]  ;;  %v2957_v30 = vld [vmem:[%s3600_s1 + $0x3c0] sm:$0xff] }
  0x41   : > { %3749 = vst [vmem:[#allocation73_spill] sm:$0xff] %v2947_v32  ;;  %3750 = vst [vmem:[#allocation74_spill] sm:$0xff] %v2952_v33  ;;  %v2962_v31 = vld [vmem:[%s3600_s1 + $0x3c8] sm:$0xff]  ;;  %v2967_v34 = vld [vmem:[%s3600_s1 + $0x3d0] sm:$0xff] }
  0x42   : > { %3751 = vst [vmem:[#allocation75_spill] sm:$0xff] %v2957_v30  ;;  %3752 = vst [vmem:[#allocation76_spill] sm:$0xff] %v2962_v31  ;;  %v2972_v32 = vld [vmem:[%s3600_s1 + $0x3d8] sm:$0xff]  ;;  %v2977_v33 = vld [vmem:[%s3600_s1 + $0x3e0] sm:$0xff] }
  0x43   : > { %3753 = vst [vmem:[#allocation77_spill] sm:$0xff] %v2967_v34  ;;  %3754 = vst [vmem:[#allocation78_spill] sm:$0xff] %v2972_v32  ;;  %v2982_v30 = vld [vmem:[%s3600_s1 + $0x3e8] sm:$0xff]  ;;  %v2987_v31 = vld [vmem:[%s3600_s1 + $0x3f0] sm:$0xff] }
  0x44   : > { %3755 = vst [vmem:[#allocation79_spill] sm:$0xff] %v2977_v33  ;;  %3756 = vst [vmem:[#allocation80_spill] sm:$0xff] %v2982_v30  ;;  %v2992_v34 = vld [vmem:[%s3600_s1 + $0x3f8] sm:$0xff]  ;;  %v2997_v32 = vld [vmem:[%s3602_s3] sm:$0xf] }
  0x45   : > { %3757 = vst [vmem:[#allocation81_spill] sm:$0xff] %v2987_v31  ;;  %3758 = vst [vmem:[#allocation82_spill] sm:$0xff] %v2992_v34  ;;  %v3003_v33 = vld [vmem:[%s3602_s3 + $0x4] sm:$0xf]  ;;  %v3008_v31 = vld [vmem:[%s3602_s3 + $0x8] sm:$0xf] }
  0x46   : > { %3759 = vst [vmem:[#allocation83_spill] sm:$0xff] %v2997_v32  ;;  %3760 = vst [vmem:[#allocation84_spill] sm:$0xff] %v3003_v33  ;;  %v3013_v34 = vld [vmem:[%s3602_s3 + $0xc] sm:$0xf]  ;;  %v3018_v32 = vld [vmem:[%s3602_s3 + $0x10] sm:$0xf] }
  0x47   : > { %3761 = vst [vmem:[#allocation85_spill] sm:$0xff] %v3008_v31  ;;  %3762 = vst [vmem:[#allocation86_spill] sm:$0xff] %v3013_v34  ;;  %v3023_v30 = vld [vmem:[%s3602_s3 + $0x14] sm:$0xf]  ;;  %v3028_v33 = vld [vmem:[%s3602_s3 + $0x18] sm:$0xf] }
  0x48   : > { %3763 = vst [vmem:[#allocation87_spill] sm:$0xff] %v3018_v32  ;;  %3764 = vst [vmem:[#allocation88_spill] sm:$0xff] %v3023_v30  ;;  %v3033_v31 = vld [vmem:[%s3602_s3 + $0x1c] sm:$0xf]  ;;  %v3038_v34 = vld [vmem:[%s3602_s3 + $0x20] sm:$0xf] }
  0x49   : > { %3765 = vst [vmem:[#allocation89_spill] sm:$0xff] %v3028_v33  ;;  %3766 = vst [vmem:[#allocation90_spill] sm:$0xff] %v3033_v31  ;;  %v3043_v32 = vld [vmem:[%s3602_s3 + $0x24] sm:$0xf]  ;;  %v3048_v30 = vld [vmem:[%s3602_s3 + $0x28] sm:$0xf] }
  0x4a   : > { %3767 = vst [vmem:[#allocation91_spill] sm:$0xff] %v3038_v34  ;;  %3768 = vst [vmem:[#allocation92_spill] sm:$0xff] %v3043_v32  ;;  %v3053_v33 = vld [vmem:[%s3602_s3 + $0x2c] sm:$0xf]  ;;  %v3058_v31 = vld [vmem:[%s3602_s3 + $0x30] sm:$0xf] }
  0x4b   : > { %3769 = vst [vmem:[#allocation93_spill] sm:$0xff] %v3048_v30  ;;  %3770 = vst [vmem:[#allocation94_spill] sm:$0xff] %v3053_v33  ;;  %v3063_v34 = vld [vmem:[%s3602_s3 + $0x34] sm:$0xf]  ;;  %v3068_v32 = vld [vmem:[%s3602_s3 + $0x38] sm:$0xf] }
  0x4c   : > { %3771 = vst [vmem:[#allocation95_spill] sm:$0xff] %v3058_v31  ;;  %3772 = vst [vmem:[#allocation96_spill] sm:$0xff] %v3063_v34  ;;  %v3073_v30 = vld [vmem:[%s3602_s3 + $0x3c] sm:$0xf]  ;;  %v3078_v33 = vld [vmem:[%s3602_s3 + $0x40] sm:$0xf] }
  0x4d   : > { %3773 = vst [vmem:[#allocation97_spill] sm:$0xff] %v3068_v32  ;;  %3774 = vst [vmem:[#allocation98_spill] sm:$0xff] %v3073_v30  ;;  %v3083_v31 = vld [vmem:[%s3602_s3 + $0x44] sm:$0xf]  ;;  %v3088_v34 = vld [vmem:[%s3602_s3 + $0x48] sm:$0xf] }
  0x4e   : > { %3775 = vst [vmem:[#allocation99_spill] sm:$0xff] %v3078_v33  ;;  %3776 = vst [vmem:[#allocation100_spill] sm:$0xff] %v3083_v31  ;;  %v3093_v32 = vld [vmem:[%s3602_s3 + $0x4c] sm:$0xf]  ;;  %v3098_v30 = vld [vmem:[%s3602_s3 + $0x50] sm:$0xf] }
  0x4f   : > { %3777 = vst [vmem:[#allocation101_spill] sm:$0xff] %v3088_v34  ;;  %3778 = vst [vmem:[#allocation102_spill] sm:$0xff] %v3093_v32  ;;  %v3103_v33 = vld [vmem:[%s3602_s3 + $0x54] sm:$0xf]  ;;  %v3113_v34 = vld [vmem:[%s3602_s3 + $0x58] sm:$0xf] }
  0x50   : > { %3779 = vst [vmem:[#allocation103_spill] sm:$0xff] %v3098_v30  ;;  %3780 = vst [vmem:[#allocation104_spill] sm:$0xff] %v3103_v33  ;;  %v3118_v30 = vld [vmem:[%s3602_s3 + $0x5c] sm:$0xf]  ;;  %v3123_v33 = vld [vmem:[%s3602_s3 + $0x60] sm:$0xf] }
  0x51   : > { %3781 = vst [vmem:[#allocation105_spill] sm:$0xff] %v3113_v34  ;;  %3782 = vst [vmem:[#allocation106_spill] sm:$0xff] %v3118_v30  ;;  %v3128_v32 = vld [vmem:[%s3602_s3 + $0x64] sm:$0xf]  ;;  %v3133_v34 = vld [vmem:[%s3602_s3 + $0x68] sm:$0xf] }
  0x52   : > { %3783 = vst [vmem:[#allocation107_spill] sm:$0xff] %v3123_v33  ;;  %3784 = vst [vmem:[#allocation108_spill] sm:$0xff] %v3128_v32  ;;  %v3138_v30 = vld [vmem:[%s3602_s3 + $0x6c] sm:$0xf]  ;;  %v3143_v33 = vld [vmem:[%s3601_s2] ss:$0 sm:$0xff] }
  0x53   : > { %3785 = vst [vmem:[#allocation109_spill] sm:$0xff] %v3133_v34  ;;  %3786 = vst [vmem:[#allocation110_spill] sm:$0xff] %v3138_v30  ;;  %v3148_v32 = vld [vmem:[%s3603_s4] ss:$0 sm:$0xff]  ;;  %v401_v34 = vld [vmem:[%s3108_s29 + $0x8] sm:$0xff] }
  0x54   : > { %3787 = vst [vmem:[#allocation111_spill] sm:$0xff] %v3143_v33  ;;  %3788 = vst [vmem:[#allocation112_spill] sm:$0xff] %v3148_v32  ;;  %v399_v31 = vld [vmem:[%s3108_s29] sm:$0xff]  ;;  %v403_v35 = vld [vmem:[%s3108_s29 + $0x10] sm:$0xff] }
  0x55   : > { %400 = vst [vmem:[#allocation2 + $0x40] sm:$0xff] %v399_v31  ;;  %v405_v28 = vld [vmem:[%s3108_s29 + $0x18] sm:$0xff]  ;;  %402 = vst [vmem:[#allocation2 + $0x48] sm:$0xff] %v401_v34  ;;  %v407_v30 = vld [vmem:[%s3108_s29 + $0x20] sm:$0xff] }
  0x56   : > { %404 = vst [vmem:[#allocation2 + $0x50] sm:$0xff] %v403_v35  ;;  %406 = vst [vmem:[#allocation2 + $0x58] sm:$0xff] %v405_v28  ;;  %v409_v33 = vld [vmem:[%s3108_s29 + $0x28] sm:$0xff]  ;;  %v411_v29 = vld [vmem:[%s3108_s29 + $0x30] sm:$0xff] }
  0x57   : > { %408 = vst [vmem:[#allocation2 + $0x60] sm:$0xff] %v407_v30  ;;  %410 = vst [vmem:[#allocation2 + $0x68] sm:$0xff] %v409_v33  ;;  %v413_v32 = vld [vmem:[%s3108_s29 + $0x38] sm:$0xff]  ;;  %v415_v31 = vld [vmem:[%s3108_s29 + $0x40] sm:$0xff] }
  0x58   : > { %412 = vst [vmem:[#allocation2 + $0x70] sm:$0xff] %v411_v29  ;;  %v417_v36 = vld [vmem:[%s3108_s29 + $0x48] sm:$0xff]  ;;  %414 = vst [vmem:[#allocation2 + $0x78] sm:$0xff] %v413_v32  ;;  %v419_v34 = vld [vmem:[%s3108_s29 + $0x50] sm:$0xff] }
  0x59   : > { %416 = vst [vmem:[#allocation2 + $0x80] sm:$0xff] %v415_v31  ;;  %418 = vst [vmem:[#allocation2 + $0x88] sm:$0xff] %v417_v36  ;;  %v421_v37 = vld [vmem:[%s3108_s29 + $0x58] sm:$0xff]  ;;  %v423_v35 = vld [vmem:[%s3108_s29 + $0x60] sm:$0xff] }
  0x5a   : > { %420 = vst [vmem:[#allocation2 + $0x90] sm:$0xff] %v419_v34  ;;  %422 = vst [vmem:[#allocation2 + $0x98] sm:$0xff] %v421_v37  ;;  %v425_v28 = vld [vmem:[%s3108_s29 + $0x68] sm:$0xff]  ;;  %v427_v26 = vld [vmem:[%s3108_s29 + $0x70] sm:$0xff] }
  0x5b   : > { %424 = vst [vmem:[#allocation2 + $0xa0] sm:$0xff] %v423_v35  ;;  %v429_v27 = vld [vmem:[%s3108_s29 + $0x78] sm:$0xff]  ;;  %426 = vst [vmem:[#allocation2 + $0xa8] sm:$0xff] %v425_v28 }
  0x5c   : > { %428 = vst [vmem:[#allocation2 + $0xb0] sm:$0xff] %v427_v26  ;;  %430 = vst [vmem:[#allocation2 + $0xb8] sm:$0xff] %v429_v27 }
  0x5d   : > { %438 = vsyncadd [#allocation3], 2048  ;;  %v2044_v29 = vcombine.high %v2351_v0, %v2356_v1  ;;  %v2108_v30 = vcombine.high %v2677_v58, %v2682_v60  ;;  %v2043_v32 = vcombine.low %v2351_v0, %v2356_v1  ;;  %v2107_v33 = vcombine.low %v2677_v58, %v2682_v60 }
  0x5e   : > { %2277 = dma.done.wait [#allocation3], 2048 }
  0x5f   : > { %2278 = vsyncadd [#allocation3], 4294965248  ;;  %v2046_v36 = vcombine.high %v2361_v2, %v2366_v3  ;;  %v2110_v26 = vcombine.high %v2687_v61, %v2692_v62  ;;  %1283 = vmatprep.subr.bf16.mxu1 %v2044_v29  ;;  %1389 = vmatprep.subr.bf16.mxu0 %v2108_v30  ;;  %v2045_v27 = vcombine.low %v2361_v2, %v2366_v3  ;;  %vm2291_vm0 = vmmov 0   ;;  %v547_v35 = vld [vmem:[#allocation2 + $0x68] sm:$0xff]  ;;  %s2294_s24 = smov 96   ;;  %s2295_s25 = smov 64  }
  0x60   : > { %1284 = vmatpush1.bf16.msra.mxu1 %v2043_v32  ;;  %1390 = vmatpush1.bf16.msra.mxu0 %v2107_v33  ;;  %v2109_v0 = vcombine.low %v2687_v61, %v2692_v62  ;;  %v2048_v1 = vcombine.high %v2371_v4, %v2376_v5  ;;  %v2112_v37 = vcombine.high %v2697_v63, %v2702_v59  ;;  %vm611_vm1 = vmpackc.low %vm2291_vm0, %vm2291_vm0  ;;  %vm2292_vm2 = vmmov 1   ;;  %s2296_s27 = smov 32  }
  0x61   : > { %1285 = vmatprep.subr.bf16.mxu1 %v2046_v36  ;;  %1391 = vmatprep.subr.bf16.mxu0 %v2110_v26  ;;  %v2047_v58 = vcombine.low %v2371_v4, %v2376_v5  ;;  %v2111_v60 = vcombine.low %v2697_v63, %v2702_v59  ;;  %v2050_v2 = vcombine.high %v2382_v6, %v2387_v7  ;;  %vm612_vm3 = vmpackc.low %vm2292_vm2, %vm2292_vm2  ;;  %v2293_v59 = vmov 0  }
  0x62   : > { %v2114_v3 = vcombine.high %v2707_v56, %v2712_v57  ;;  %v2049_v61 = vcombine.low %v2382_v6, %v2387_v7  ;;  %v2113_v62 = vcombine.low %v2707_v56, %v2712_v57  ;;  %v2052_v4 = vcombine.high %v2392_v8, %v2397_v9  ;;  %v535_v56 = vld [vmem:[#allocation2 + $0x8] sm:$0xff] }
  0x63   : > { %v2116_v5 = vcombine.high %v2717_v54, %v2722_v55  ;;  %v2051_v6 = vcombine.low %v2392_v8, %v2397_v9  ;;  %v2115_v7 = vcombine.low %v2717_v54, %v2722_v55  ;;  %v543_v57 = vld [vmem:[#allocation2 + $0x48] sm:$0xff]  ;;  %v3207_v63 = vsel %vm611_vm1, 65537, %v2293_v59 }
  0x64   : > { %1286 = vmatpush1.bf16.msra.mxu1 %v2045_v27  ;;  %1392 = vmatpush1.bf16.msra.mxu0 %v2109_v0  ;;  %v3210_v31 = vsel %vm612_vm3, 65537, %v2293_v59  ;;  %v2054_v34 = vcombine.high %v2402_v10, %v2407_v11  ;;  %v2118_v8 = vcombine.high %v2727_v52, %v2732_v53  ;;  %v539_v9 = vld [vmem:[#allocation2 + $0x28] sm:$0xff]  ;;  %v567_v54 = vpack.c.bf16 %v543_v57, %v535_v56  ;;  %v3794_v0 = vld [vmem:[#allocation45_spill] sm:$0xff]  ;;  %v534_v57 = vld [vmem:[#allocation2] sm:$0xff] }
  0x65   : > { %1287 = vmatprep.subr.bf16.mxu1 %v2048_v1  ;;  %1393 = vmatprep.subr.bf16.mxu0 %v2112_v37  ;;  %v2041_v55 = vcombine.low %v3207_v63, %v3210_v31  ;;  %v2053_v28 = vcombine.low %v2402_v10, %v2407_v11  ;;  %v2117_v29 = vcombine.low %v2727_v52, %v2732_v53  ;;  %vm1499_vm6 = vcmask 1046528  }
  0x66   : > { %v571_v30 = vpack.c.bf16 %v547_v35, %v539_v9  ;;  %v2056_v32 = vcombine.high %v2412_v12, %v2417_v13  ;;  %v2120_v33 = vcombine.high %v2737_v50, %v2742_v51  ;;  %v2055_v10 = vcombine.low %v2412_v12, %v2417_v13  ;;  %v542_v9 = vld [vmem:[#allocation2 + $0x40] sm:$0xff] }
  0x67   : > { %vm3226_vm4 = vcmp.ne.s16.totalorder %v2041_v55, 0  ;;  %v2119_v11 = vcombine.low %v2737_v50, %v2742_v51  ;;  %v2058_v52 = vcombine.high %v2422_v14, %v2427_v15  ;;  %v2122_v53 = vcombine.high %v2747_v48, %v2752_v49  ;;  %v538_v35 = vld [vmem:[#allocation2 + $0x20] sm:$0xff]  ;;  %v3803_v55 = vld [vmem:[#allocation14_spill] sm:$0xff] }
  0x68   : > { %1288 = vmatpush1.bf16.msra.mxu1 %v2047_v58  ;;  %1394 = vmatpush1.bf16.msra.mxu0 %v2111_v60  ;;  %v2057_v26 = vcombine.low %v2422_v14, %v2427_v15  ;;  %v2121_v27 = vcombine.low %v2747_v48, %v2752_v49  ;;  %v2060_v12 = vcombine.high %v2432_v16, %v2437_v17  ;;  %v3798_v60 = vld [vmem:[#allocation47_spill] sm:$0xff]  ;;  %vm1554_vm7 = vcmask 1045504  }
  0x69   : > { %1289 = vmatprep.subr.bf16.mxu1 %v2050_v2  ;;  %1395 = vmatprep.subr.bf16.mxu0 %v2114_v3  ;;  %v2124_v13 = vcombine.high %v2757_v46, %v2762_v47  ;;  %v2059_v50 = vcombine.low %v2432_v16, %v2437_v17  ;;  %v2123_v51 = vcombine.low %v2757_v46, %v2762_v47  ;;  %vm1599_vm8 = vcmask 1043456  }
  0x6a   : > { %2171 = vmatprep.mubr.msk.bf16.mxu1 %vm3226_vm4, %v567_v54  ;;  %2179 = vmatprep.mubr.msk.bf16.mxu0 %vm3226_vm4, %v571_v30  ;;  %v2062_v14 = vcombine.high %v2447_v18, %v2452_v19  ;;  %v2126_v15 = vcombine.high %v2767_v44, %v2772_v45  ;;  %v2061_v48 = vcombine.low %v2447_v18, %v2452_v19  ;;  %v546_v54 = vld [vmem:[#allocation2 + $0x60] sm:$0xff]  ;;  %v3805_v30 = vld [vmem:[#allocation52_spill] sm:$0xff]  ;;  %vm1698_vm11 = vsmask.f32 5376 }
  0x6b   : > { %v2125_v49 = vcombine.low %v2767_v44, %v2772_v45  ;;  %v2064_v16 = vcombine.high %v2457_v20, %v2462_v21  ;;  %v2128_v17 = vcombine.high %v2777_v42, %v2782_v43  ;;  %v2063_v46 = vcombine.low %v2457_v20, %v2462_v21 }
  0x6c   : > { %1290 = vmatpush1.bf16.msra.mxu1 %v2049_v61  ;;  %1396 = vmatpush1.bf16.msra.mxu0 %v2113_v62  ;;  %v2127_v47 = vcombine.low %v2777_v42, %v2782_v43  ;;  %v2066_v18 = vcombine.high %v2467_v22, %v2472_v23  ;;  %v2130_v19 = vcombine.high %v2787_v40, %v2792_v41  ;;  %v3799_v62 = vld [vmem:[#allocation12_spill] sm:$0xff]  ;;  %vm1659_vm12 = vsmask.f32 7424 }
  0x6d   : > { %1291 = vmatprep.subr.bf16.mxu1 %v2052_v4  ;;  %1397 = vmatprep.subr.bf16.mxu0 %v2116_v5  ;;  %v2065_v44 = vcombine.low %v2467_v22, %v2472_v23  ;;  %v2129_v45 = vcombine.low %v2787_v40, %v2792_v41  ;;  %v2068_v20 = vcombine.high %v2477_v24, %v2482_v25  ;;  %v3791_v22 = vld [vmem:[#allocation8_spill] sm:$0xff]  ;;  %v3792_v23 = vld [vmem:[#allocation7_spill] sm:$0xff]  ;;  %v3793_v41 = vld [vmem:[#allocation46_spill] sm:$0xff]  ;;  %vm1682_vm13 = vsmask.f32 6400 }
  0x6e   : > { %v2132_v21 = vcombine.high %v2797_v38, %v2802_v39  ;;  %v2067_v42 = vcombine.low %v2477_v24, %v2482_v25  ;;  %v2131_v43 = vcombine.low %v2797_v38, %v2802_v39  ;;  %v2070_v40 = vcombine.high %v3792_v23, %v3791_v22  ;;  %v3795_v24 = vld [vmem:[#allocation10_spill] sm:$0xff]  ;;  %v3796_v25 = vld [vmem:[#allocation9_spill] sm:$0xff]  ;;  %v3797_v39 = vld [vmem:[#allocation48_spill] sm:$0xff] }
  0x6f   : > { %v2134_v1 = vcombine.high %v3794_v0, %v3793_v41  ;;  %v2069_v37 = vcombine.low %v3792_v23, %v3791_v22  ;;  %v2133_v58 = vcombine.low %v3794_v0, %v3793_v41  ;;  %v2072_v38 = vcombine.high %v3796_v25, %v3795_v24  ;;  %v3800_v4 = vld [vmem:[#allocation11_spill] sm:$0xff] }
  0x70   : > { %1292 = vmatpush1.bf16.msra.mxu1 %v2051_v6  ;;  %1398 = vmatpush1.bf16.msra.mxu0 %v2115_v7  ;;  %v2136_v2 = vcombine.high %v3798_v60, %v3797_v39  ;;  %v2071_v3 = vcombine.low %v3796_v25, %v3795_v24  ;;  %v2135_v61 = vcombine.low %v3798_v60, %v3797_v39  ;;  %v3801_v6 = vld [vmem:[#allocation50_spill] sm:$0xff]  ;;  %v3802_v7 = vld [vmem:[#allocation49_spill] sm:$0xff]  ;;  %v3816_v22 = vld [vmem:[#allocation55_spill] sm:$0xff]  ;;  %vm1708_vm14 = vcmask 1044480  }
  0x71   : > { %1293 = vmatprep.subr.bf16.mxu1 %v2054_v34  ;;  %1399 = vmatprep.subr.bf16.mxu0 %v2118_v8  ;;  %v2074_v5 = vcombine.high %v3800_v4, %v3799_v62  ;;  %v2138_v56 = vcombine.high %v3802_v7, %v3801_v6  ;;  %v2073_v34 = vcombine.low %v3800_v4, %v3799_v62  ;;  %v3818_v39 = vld [vmem:[#allocation19_spill] sm:$0xff]  ;;  %vm1714_vm15 = vcmask 261120  }
  0x72   : > { %v2137_v8 = vcombine.low %v3802_v7, %v3801_v6  ;;  %v3821_v7 = vld [vmem:[#allocation22_spill] sm:$0xff]  ;;  %vm1717_vm0 = vcmask 523264   ;;  %vm1720_vm1 = vcmask 785408   ;;  %vm1894_vm2 = vcmask 130048  }
  0x73   : > { %vm1897_vm3 = vcmask 125952  }
  0x74   : > { %1294 = vmatpush1.bf16.msra.mxu1 %v2053_v28  ;;  %1400 = vmatpush1.bf16.msra.mxu0 %v2117_v29  ;;  %v3804_v28 = vld [vmem:[#allocation13_spill] sm:$0xff] }
  0x75   : > { %1295 = vmatprep.subr.bf16.mxu1 %v2056_v32  ;;  %1401 = vmatprep.subr.bf16.mxu0 %v2120_v33  ;;  %v2076_v29 = vcombine.high %v3804_v28, %v3803_v55  ;;  %v3806_v32 = vld [vmem:[#allocation51_spill] sm:$0xff] }
  0x76   : > { %v2140_v33 = vcombine.high %v3806_v32, %v3805_v30 }
  0x78   : > { %1296 = vmatpush1.bf16.msra.mxu1 %v2055_v10  ;;  %1402 = vmatpush1.bf16.msra.mxu0 %v2119_v11  ;;  %v551_v10 = vld [vmem:[#allocation2 + $0x88] sm:$0xff]  ;;  %v566_v11 = vpack.c.bf16 %v542_v9, %v534_v57 }
  0x79   : > { %1297 = vmatprep.subr.bf16.mxu1 %v2058_v52  ;;  %1403 = vmatprep.subr.bf16.mxu0 %v2122_v53  ;;  %v570_v52 = vpack.c.bf16 %v546_v54, %v538_v35  ;;  %v559_v53 = vld [vmem:[#allocation2 + $0xc8] sm:$0xff] }
  0x7c   : > { %1298 = vmatpush1.bf16.msra.mxu1 %v2057_v26  ;;  %1404 = vmatpush1.bf16.msra.mxu0 %v2121_v27  ;;  %v2042_v26 = vcombine.low %v3210_v31, %v3207_v63  ;;  %v555_v27 = vld [vmem:[#allocation2 + $0xa8] sm:$0xff] }
  0x7d   : > { %1299 = vmatprep.subr.bf16.mxu1 %v2060_v12  ;;  %1405 = vmatprep.subr.bf16.mxu0 %v2124_v13  ;;  %v563_v12 = vld [vmem:[#allocation2 + $0xe8] sm:$0xff]  ;;  %v2075_v13 = vcombine.low %v3804_v28, %v3803_v55  ;;  %v3826_v28 = vld [vmem:[#allocation23_spill] sm:$0xff] }
  0x7e   : > { %v579_v63 = vpack.c.bf16 %v563_v12, %v555_v27  ;;  %vm3328_vm5 = vcmp.ne.s16.totalorder %v2042_v26, 0  ;;  %v3825_v55 = vld [vmem:[#allocation24_spill] sm:$0xff]  ;;  %v3832_v12 = vld [vmem:[#allocation63_spill] sm:$0xff] }
  0x7f   : > { %v3831_v27 = vld [vmem:[#allocation64_spill] sm:$0xff] }
  0x80   : > { %1300 = vmatpush1.bf16.msra.mxu1 %v2059_v50  ;;  %1406 = vmatpush1.bf16.msra.mxu0 %v2123_v51  ;;  %v2139_v50 = vcombine.low %v3806_v32, %v3805_v30  ;;  %v3807_v51 = vld [vmem:[#allocation16_spill] sm:$0xff]  ;;  %v3827_v30 = vld [vmem:[#allocation62_spill] sm:$0xff]  ;;  %v3828_v32 = vld [vmem:[#allocation61_spill] sm:$0xff] }
  0x81   : > { %1301 = vmatprep.subr.bf16.mxu1 %v2062_v14  ;;  %1407 = vmatprep.subr.bf16.mxu0 %v2126_v15  ;;  %v3808_v14 = vld [vmem:[#allocation15_spill] sm:$0xff] }
  0x82   : > { %v2078_v15 = vcombine.high %v3808_v14, %v3807_v51 }
  0x84   : > { %1302 = vmatpush1.bf16.msra.mxu1 %v2061_v48  ;;  %1408 = vmatpush1.bf16.msra.mxu0 %v2125_v49  ;;  %v3809_v48 = vld [vmem:[#allocation54_spill] sm:$0xff]  ;;  %v3810_v49 = vld [vmem:[#allocation53_spill] sm:$0xff] }
  0x85   : > { %1303 = vmatprep.subr.bf16.mxu1 %v2064_v16  ;;  %1409 = vmatprep.subr.bf16.mxu0 %v2128_v17  ;;  %v2142_v16 = vcombine.high %v3810_v49, %v3809_v48  ;;  %v575_v17 = vpack.c.bf16 %v559_v53, %v551_v10  ;;  %v2085_v10 = vcombine.low %v3826_v28, %v3825_v55  ;;  %v3830_v53 = vld [vmem:[#allocation25_spill] sm:$0xff] }
  0x88   : > { %1304 = vmatpush1.bf16.msra.mxu1 %v2063_v46  ;;  %1410 = vmatpush1.bf16.msra.mxu0 %v2127_v47  ;;  %v550_v46 = vld [vmem:[#allocation2 + $0x80] sm:$0xff]  ;;  %v2077_v47 = vcombine.low %v3808_v14, %v3807_v51  ;;  %v2151_v51 = vcombine.low %v3832_v12, %v3831_v27  ;;  %v3833_v14 = vld [vmem:[#allocation28_spill] sm:$0xff] }
  0x89   : > { %1305 = vmatprep.subr.bf16.mxu1 %v2066_v18  ;;  %1411 = vmatprep.subr.bf16.mxu0 %v2130_v19  ;;  %v2141_v18 = vcombine.low %v3810_v49, %v3809_v48  ;;  %v558_v19 = vld [vmem:[#allocation2 + $0xc0] sm:$0xff]  ;;  %v3835_v49 = vld [vmem:[#allocation66_spill] sm:$0xff] }
  0x8a   : > { %v574_v41 = vpack.c.bf16 %v558_v19, %v550_v46 }
  0x8c   : > { %1306 = vmatpush1.bf16.msra.mxu1 %v2065_v44  ;;  %1412 = vmatpush1.bf16.msra.mxu0 %v2129_v45  ;;  %v554_v44 = vld [vmem:[#allocation2 + $0xa0] sm:$0xff] }
  0x8d   : > { %1307 = vmatprep.subr.bf16.mxu1 %v2068_v20  ;;  %1413 = vmatprep.subr.bf16.mxu0 %v2132_v21  ;;  %v562_v45 = vld [vmem:[#allocation2 + $0xe0] sm:$0xff]  ;;  %v3813_v20 = vld [vmem:[#allocation18_spill] sm:$0xff]  ;;  %v3814_v21 = vld [vmem:[#allocation17_spill] sm:$0xff] }
  0x8e   : > { %v578_v0 = vpack.c.bf16 %v562_v45, %v554_v44  ;;  %v2079_v24 = vcombine.low %v3814_v21, %v3813_v20  ;;  %v3839_v44 = vld [vmem:[#allocation68_spill] sm:$0xff]  ;;  %v3840_v45 = vld [vmem:[#allocation67_spill] sm:$0xff] }
  0x90   : > { %1308 = vmatpush1.bf16.msra.mxu1 %v2067_v42  ;;  %1414 = vmatpush1.bf16.msra.mxu0 %v2131_v43  ;;  %v2080_v42 = vcombine.high %v3814_v21, %v3813_v20  ;;  %v3815_v43 = vld [vmem:[#allocation56_spill] sm:$0xff]  ;;  %v2156_v20 = vcombine.high %v3840_v45, %v3839_v44 }
  0x91   : > { %1309 = vmatprep.subr.bf16.mxu1 %v2070_v40  ;;  %1415 = vmatprep.subr.bf16.mxu0 %v2134_v1  ;;  %v2144_v23 = vcombine.high %v3816_v22, %v3815_v43  ;;  %v537_v40 = vld [vmem:[#allocation2 + $0x18] sm:$0xff]  ;;  %v2143_v25 = vcombine.low %v3816_v22, %v3815_v43  ;;  %v3841_v43 = vld [vmem:[#allocation32_spill] sm:$0xff]  ;;  %v3842_v22 = vld [vmem:[#allocation31_spill] sm:$0xff] }
  0x92   : > { %v545_v1 = vld [vmem:[#allocation2 + $0x58] sm:$0xff] }
  0x93   : > { %v569_v62 = vpack.c.bf16 %v545_v1, %v537_v40  ;;  %v3843_v40 = vld [vmem:[#allocation70_spill] sm:$0xff]  ;;  %v2093_v1 = vcombine.low %v3842_v22, %v3841_v43 }
  0x94   : > { %1310 = vmatpush1.bf16.msra.mxu1 %v2069_v37  ;;  %1416 = vmatpush1.bf16.msra.mxu0 %v2133_v58  ;;  %v541_v37 = vld [vmem:[#allocation2 + $0x38] sm:$0xff] }
  0x95   : > { %1311 = vmatprep.subr.bf16.mxu1 %v2072_v38  ;;  %1417 = vmatprep.subr.bf16.mxu0 %v2136_v2  ;;  %v549_v58 = vld [vmem:[#allocation2 + $0x78] sm:$0xff]  ;;  %v3817_v38 = vld [vmem:[#allocation20_spill] sm:$0xff] }
  0x96   : > { %v2082_v60 = vcombine.high %v3818_v39, %v3817_v38  ;;  %v3819_v2 = vld [vmem:[#allocation58_spill] sm:$0xff]  ;;  %v573_v4 = vpack.c.bf16 %v549_v58, %v541_v37 }
  0x97   : > { %v3845_v58 = vld [vmem:[#allocation34_spill] sm:$0xff] }
  0x98   : > { %1312 = vmatpush1.bf16.msra.mxu1 %v2071_v3  ;;  %1418 = vmatpush1.bf16.msra.mxu0 %v2135_v61  ;;  %v3820_v3 = vld [vmem:[#allocation57_spill] sm:$0xff] }
  0x99   : > { %1313 = vmatprep.subr.bf16.mxu1 %v2074_v5  ;;  %1419 = vmatprep.subr.bf16.mxu0 %v2138_v56  ;;  %v2146_v61 = vcombine.high %v3820_v3, %v3819_v2  ;;  %v2081_v5 = vcombine.low %v3818_v39, %v3817_v38  ;;  %v2145_v6 = vcombine.low %v3820_v3, %v3819_v2  ;;  %v3822_v56 = vld [vmem:[#allocation21_spill] sm:$0xff]  ;;  %v3847_v38 = vld [vmem:[#allocation72_spill] sm:$0xff]  ;;  %v3848_v39 = vld [vmem:[#allocation71_spill] sm:$0xff] }
  0x9a   : > { %v2084_v57 = vcombine.high %v3822_v56, %v3821_v7  ;;  %v2083_v35 = vcombine.low %v3822_v56, %v3821_v7  ;;  %v2159_v3 = vcombine.low %v3848_v39, %v3847_v38 }
  0x9c   : > { %1314 = vmatpush1.bf16.msra.mxu1 %v2073_v34  ;;  %1420 = vmatpush1.bf16.msra.mxu0 %v2137_v8  ;;  %v3823_v34 = vld [vmem:[#allocation60_spill] sm:$0xff]  ;;  %v3824_v8 = vld [vmem:[#allocation59_spill] sm:$0xff] }
  0x9d   : > { %1336 = vmatprep.subr.bf16.mxu1 %v2076_v29  ;;  %1442 = vmatprep.subr.bf16.mxu0 %v2140_v33  ;;  %v2148_v9 = vcombine.high %v3824_v8, %v3823_v34  ;;  %v2147_v54 = vcombine.low %v3824_v8, %v3823_v34  ;;  %v2086_v29 = vcombine.high %v3826_v28, %v3825_v55  ;;  %v3853_v34 = vld [vmem:[#allocation38_spill] sm:$0xff]  ;;  %v3854_v8 = vld [vmem:[#allocation37_spill] sm:$0xff] }
  0x9e   : > { %v2150_v33 = vcombine.high %v3828_v32, %v3827_v30  ;;  %v2099_v28 = vcombine.low %v3854_v8, %v3853_v34 }
  0x9f   : > { %2172 = vmatmul.mubr.msk.bf16.vlgmr.msra.gmra.mrb[0].mxu1 %vm3226_vm4, %v566_v11  ;;  %2180 = vmatmul.mubr.msk.bf16.vlgmr.msra.gmra.mrb[0].mxu0 %vm3226_vm4, %v570_v52  ;;  %v2149_v11 = vcombine.low %v3828_v32, %v3827_v30  ;;  %v3829_v52 = vld [vmem:[#allocation26_spill] sm:$0xff]  ;;  %v3857_v30 = vld [vmem:[#allocation40_spill] sm:$0xff]  ;;  %v3858_v32 = vld [vmem:[#allocation39_spill] sm:$0xff] }
  0xa0   : > { %1337 = vmatpush1.bf16.msra.mxu1 %v2075_v13  ;;  %1443 = vmatpush1.bf16.msra.mxu0 %v2139_v50  ;;  %v2088_v26 = vcombine.high %v3830_v53, %v3829_v52  ;;  %v2152_v13 = vcombine.high %v3832_v12, %v3831_v27  ;;  %v2087_v50 = vcombine.low %v3830_v53, %v3829_v52  ;;  %v3861_v27 = vld [vmem:[#allocation42_spill] sm:$0xff]  ;;  %v3862_v12 = vld [vmem:[#allocation41_spill] sm:$0xff] }
  0xa1   : > { %1338 = vmatprep.subr.bf16.mxu1 %v2078_v15  ;;  %1444 = vmatprep.subr.bf16.mxu0 %v2142_v16  ;;  %v3834_v15 = vld [vmem:[#allocation27_spill] sm:$0xff]  ;;  %v3836_v16 = vld [vmem:[#allocation65_spill] sm:$0xff]  ;;  %v2101_v53 = vcombine.low %v3858_v32, %v3857_v30 }
  0xa2   : > { %2173 = vmatprep.mubr.msk.bf16.mxu1 %vm3328_vm5, %v575_v17  ;;  %2181 = vmatprep.mubr.msk.bf16.mxu0 %vm3328_vm5, %v579_v63  ;;  %v2090_v48 = vcombine.high %v3834_v15, %v3833_v14  ;;  %v2154_v17 = vcombine.high %v3836_v16, %v3835_v49  ;;  %v2089_v63 = vcombine.low %v3834_v15, %v3833_v14 }
  0xa3   : > { %v2153_v46 = vcombine.low %v3836_v16, %v3835_v49  ;;  %v2103_v15 = vcombine.low %v3862_v12, %v3861_v27  ;;  %v3865_v49 = vld [vmem:[#allocation44_spill] sm:$0xff]  ;;  %v3866_v16 = vld [vmem:[#allocation43_spill] sm:$0xff] }
  0xa4   : > { %1339 = vmatpush1.bf16.msra.mxu1 %v2077_v47  ;;  %1445 = vmatpush1.bf16.msra.mxu0 %v2141_v18  ;;  %v3837_v47 = vld [vmem:[#allocation30_spill] sm:$0xff]  ;;  %v3838_v18 = vld [vmem:[#allocation29_spill] sm:$0xff] }
  0xa5   : > { %1340 = vmatprep.subr.bf16.mxu1 %v2080_v42  ;;  %1446 = vmatprep.subr.bf16.mxu0 %v2144_v23  ;;  %v2092_v19 = vcombine.high %v3838_v18, %v3837_v47  ;;  %v2091_v21 = vcombine.low %v3838_v18, %v3837_v47  ;;  %v2155_v42 = vcombine.low %v3840_v45, %v3839_v44  ;;  %v536_v18 = vld [vmem:[#allocation2 + $0x10] sm:$0xff] }
  0xa6   : > { %v2094_v23 = vcombine.high %v3842_v22, %v3841_v43  ;;  %v2105_v44 = vcombine.low %v3866_v16, %v3865_v49  ;;  %v561_v43 = vld [vmem:[#allocation2 + $0xd8] sm:$0xff] }
  0xa7   : > { %2174 = vmatmul.mubr.msk.bf16.gmra.mrb[4].mxu1 %vm3328_vm5, %v574_v41  ;;  %2182 = vmatmul.mubr.msk.bf16.gmra.mrb[4].mxu0 %vm3328_vm5, %v578_v0  ;;  %v3844_v41 = vld [vmem:[#allocation69_spill] sm:$0xff]  ;;  %v557_v22 = vld [vmem:[#allocation2 + $0xb8] sm:$0xff] }
  0xa8   : > { %1341 = vmatpush1.bf16.msra.mxu1 %v2079_v24  ;;  %1447 = vmatpush1.bf16.msra.mxu0 %v2143_v25  ;;  %v2158_v0 = vcombine.high %v3844_v41, %v3843_v40  ;;  %v2157_v37 = vcombine.low %v3844_v41, %v3843_v40  ;;  %v3846_v24 = vld [vmem:[#allocation33_spill] sm:$0xff] }
  0xa9   : > { %1342 = vmatprep.subr.bf16.mxu1 %v2082_v60  ;;  %1448 = vmatprep.subr.bf16.mxu0 %v2146_v61  ;;  %v2096_v25 = vcombine.high %v3846_v24, %v3845_v58  ;;  %v2160_v60 = vcombine.high %v3848_v39, %v3847_v38  ;;  %v2095_v2 = vcombine.low %v3846_v24, %v3845_v58  ;;  %v3849_v61 = vld [vmem:[#allocation36_spill] sm:$0xff]  ;;  %v560_v58 = vld [vmem:[#allocation2 + $0xd0] sm:$0xff] }
  0xaa   : > { %2175 = vmatprep.mubr.msk.bf16.mxu1 %vm3226_vm4, %v569_v62  ;;  %2183 = vmatprep.mubr.msk.bf16.mxu0 %vm3226_vm4, %v573_v4  ;;  %v3850_v62 = vld [vmem:[#allocation35_spill] sm:$0xff]  ;;  %v556_v24 = vld [vmem:[#allocation2 + $0xb0] sm:$0xff] }
  0xab   : > { %v2098_v4 = vcombine.high %v3850_v62, %v3849_v61  ;;  %v2097_v56 = vcombine.low %v3850_v62, %v3849_v61 }
  0xac   : > { %1343 = vmatpush1.bf16.msra.mxu1 %v2081_v5  ;;  %1449 = vmatpush1.bf16.msra.mxu0 %v2145_v6  ;;  %v3851_v5 = vld [vmem:[#allocation74_spill] sm:$0xff]  ;;  %v3852_v6 = vld [vmem:[#allocation73_spill] sm:$0xff] }
  0xad   : > { %1344 = vmatprep.subr.bf16.mxu1 %v2084_v57  ;;  %1450 = vmatprep.subr.bf16.mxu0 %v2148_v9  ;;  %v2162_v7 = vcombine.high %v3852_v6, %v3851_v5  ;;  %v2161_v57 = vcombine.low %v3852_v6, %v3851_v5  ;;  %v2100_v9 = vcombine.high %v3854_v8, %v3853_v34 }
  0xb0   : > { %1345 = vmatpush1.bf16.msra.mxu1 %v2083_v35  ;;  %1451 = vmatpush1.bf16.msra.mxu0 %v2147_v54  ;;  %v3855_v35 = vld [vmem:[#allocation76_spill] sm:$0xff]  ;;  %v3856_v54 = vld [vmem:[#allocation75_spill] sm:$0xff] }
  0xb1   : > { %1346 = vmatprep.subr.bf16.mxu1 %v2086_v29  ;;  %1452 = vmatprep.subr.bf16.mxu0 %v2150_v33  ;;  %v2164_v55 = vcombine.high %v3856_v54, %v3855_v35  ;;  %v2163_v29 = vcombine.low %v3856_v54, %v3855_v35  ;;  %v2102_v33 = vcombine.high %v3858_v32, %v3857_v30 }
  0xb4   : > { %1347 = vmatpush1.bf16.msra.mxu1 %v2085_v10  ;;  %1453 = vmatpush1.bf16.msra.mxu0 %v2149_v11  ;;  %v3859_v10 = vld [vmem:[#allocation78_spill] sm:$0xff]  ;;  %v3860_v11 = vld [vmem:[#allocation77_spill] sm:$0xff] }
  0xb5   : > { %1348 = vmatprep.subr.bf16.mxu1 %v2088_v26  ;;  %1454 = vmatprep.subr.bf16.mxu0 %v2152_v13  ;;  %v2166_v52 = vcombine.high %v3860_v11, %v3859_v10  ;;  %v2165_v26 = vcombine.low %v3860_v11, %v3859_v10  ;;  %v2104_v13 = vcombine.high %v3862_v12, %v3861_v27 }
  0xb8   : > { %1349 = vmatpush1.bf16.msra.mxu1 %v2087_v50  ;;  %1455 = vmatpush1.bf16.msra.mxu0 %v2151_v51  ;;  %v3863_v50 = vld [vmem:[#allocation80_spill] sm:$0xff]  ;;  %v3864_v51 = vld [vmem:[#allocation79_spill] sm:$0xff] }
  0xb9   : > { %1350 = vmatprep.subr.bf16.mxu1 %v2090_v48  ;;  %1456 = vmatprep.subr.bf16.mxu0 %v2154_v17  ;;  %v2168_v14 = vcombine.high %v3864_v51, %v3863_v50  ;;  %v2167_v48 = vcombine.low %v3864_v51, %v3863_v50  ;;  %v2106_v17 = vcombine.high %v3866_v16, %v3865_v49 }
  0xbc   : > { %1351 = vmatpush1.bf16.msra.mxu1 %v2089_v63  ;;  %1457 = vmatpush1.bf16.msra.mxu0 %v2153_v46  ;;  %v3867_v63 = vld [vmem:[#allocation82_spill] sm:$0xff]  ;;  %v3868_v46 = vld [vmem:[#allocation81_spill] sm:$0xff] }
  0xbd   : > { %1352 = vmatprep.subr.bf16.mxu1 %v2092_v19  ;;  %1458 = vmatprep.subr.bf16.mxu0 %v2156_v20  ;;  %v2170_v47 = vcombine.high %v3868_v46, %v3867_v63  ;;  %v544_v19 = vld [vmem:[#allocation2 + $0x50] sm:$0xff]  ;;  %v2169_v45 = vcombine.low %v3868_v46, %v3867_v63 }
  0xbe   : > { %v540_v20 = vld [vmem:[#allocation2 + $0x30] sm:$0xff]  ;;  %v568_v40 = vpack.c.bf16 %v544_v19, %v536_v18 }
  0xc0   : > { %1353 = vmatpush1.bf16.msra.mxu1 %v2091_v21  ;;  %1459 = vmatpush1.bf16.msra.mxu0 %v2155_v42  ;;  %v548_v21 = vld [vmem:[#allocation2 + $0x70] sm:$0xff]  ;;  %v553_v42 = vld [vmem:[#allocation2 + $0x98] sm:$0xff] }
  0xc1   : > { %1354 = vmatprep.subr.bf16.mxu1 %v2094_v23  ;;  %1460 = vmatprep.subr.bf16.mxu0 %v2158_v0  ;;  %v565_v23 = vld [vmem:[#allocation2 + $0xf8] sm:$0xff]  ;;  %v572_v41 = vpack.c.bf16 %v548_v21, %v540_v20  ;;  %v577_v0 = vpack.c.bf16 %v561_v43, %v553_v42 }
  0xc4   : > { %1355 = vmatpush1.bf16.msra.mxu1 %v2093_v1  ;;  %1461 = vmatpush1.bf16.msra.mxu0 %v2157_v37  ;;  %v581_v1 = vpack.c.bf16 %v565_v23, %v557_v22  ;;  %v552_v37 = vld [vmem:[#allocation2 + $0x90] sm:$0xff] }
  0xc5   : > { %1356 = vmatprep.subr.bf16.mxu1 %v2096_v25  ;;  %1462 = vmatprep.subr.bf16.mxu0 %v2160_v60  ;;  %v564_v25 = vld [vmem:[#allocation2 + $0xf0] sm:$0xff]  ;;  %v576_v38 = vpack.c.bf16 %v560_v58, %v552_v37  ;;  %v3869_v58 = vld [vmem:[#allocation84_spill] sm:$0xff] }
  0xc6   : > { %v580_v39 = vpack.c.bf16 %v564_v25, %v556_v24  ;;  %v3870_v24 = vld [vmem:[#allocation83_spill] sm:$0xff] }
  0xc7   : > { %v2189_v25 = vcombine.low %v3870_v24, %v3869_v58 }
  0xc8   : > { %1357 = vmatpush1.bf16.msra.mxu1 %v2095_v2  ;;  %1463 = vmatpush1.bf16.msra.mxu0 %v2159_v3 }
  0xc9   : > { %1358 = vmatprep.subr.bf16.mxu1 %v2098_v4  ;;  %1464 = vmatprep.subr.bf16.mxu0 %v2162_v7 }
  0xcc   : > { %1359 = vmatpush1.bf16.msra.mxu1 %v2097_v56  ;;  %1465 = vmatpush1.bf16.msra.mxu0 %v2161_v57 }
  0xcd   : > { %1360 = vmatprep.subr.bf16.mxu1 %v2100_v9  ;;  %1466 = vmatprep.subr.bf16.mxu0 %v2164_v55 }
  0xd0   : > { %1361 = vmatpush1.bf16.msra.mxu1 %v2099_v28  ;;  %1467 = vmatpush1.bf16.msra.mxu0 %v2163_v29 }
  0xd1   : > { %1362 = vmatprep.subr.bf16.mxu1 %v2102_v33  ;;  %1468 = vmatprep.subr.bf16.mxu0 %v2166_v52 }
  0xd4   : > { %1363 = vmatpush1.bf16.msra.mxu1 %v2101_v53  ;;  %1469 = vmatpush1.bf16.msra.mxu0 %v2165_v26 }
  0xd5   : > { %1364 = vmatprep.subr.bf16.mxu1 %v2104_v13  ;;  %1470 = vmatprep.subr.bf16.mxu0 %v2168_v14 }
  0xd8   : > { %1365 = vmatpush1.bf16.msra.mxu1 %v2103_v15  ;;  %1471 = vmatpush1.bf16.msra.mxu0 %v2167_v48 }
  0xd9   : > { %1366 = vmatprep.subr.bf16.mxu1 %v2106_v17  ;;  %1472 = vmatprep.subr.bf16.mxu0 %v2170_v47 }
  0xdc   : > { %1367 = vmatpush1.bf16.msra.mxu1 %v2105_v44  ;;  %1473 = vmatpush1.bf16.msra.mxu0 %v2169_v45 }
  0xdd   : > { %1821 = vmatprep.subr.bf16.mxu1 %v2293_v59 }
  0xdf   : > { %2176 = vmatmul.mubr.msk.bf16.vlgmr.msra.gmra.mrb[0].mxu1 %vm3226_vm4, %v568_v40  ;;  %2184 = vmatmul.mubr.msk.bf16.vlgmr.msra.gmra.mrb[0].mxu0 %vm3226_vm4, %v572_v41 }
  0xe0   : > { %2177 = vmatprep.mubr.msk.bf16.mxu1 %vm3328_vm5, %v577_v0  ;;  %2185 = vmatprep.mubr.msk.bf16.mxu0 %vm3328_vm5, %v581_v1 }
  0xe1   : > { %1822 = vmatpush1.bf16.msra.mxu1 %v2189_v25 }
  0xe2   : > { %1823 = vmatprep.subr.bf16.mxu1 %v2293_v59 }
  0xe7   : > { %2178 = vmatmul.mubr.msk.bf16.gmra.mrb[4].mxu1 %vm3328_vm5, %v576_v38  ;;  %2186 = vmatmul.mubr.msk.bf16.gmra.mrb[4].mxu0 %vm3328_vm5, %v580_v39  ;;  %v3871_v38 = vld [vmem:[#allocation86_spill] sm:$0xff]  ;;  %v3872_v39 = vld [vmem:[#allocation85_spill] sm:$0xff] }
 0x1b2   : > { %v1370_v36 = vpop.f32.mrb[0].mxu1  ;;  %v1476_v60 = vpop.f32.mrb[0].mxu0 }
 0x1b3   : > { %v2209_v2 = vadd.f32 %v1476_v60, %v1370_v36  ;;  %v1372_v3 = vpop.f32.mrb[1].mxu1  ;;  %v1478_v61 = vpop.f32.mrb[1].mxu0  ;;  %v2190_v36 = vcombine.low %v3872_v39, %v3871_v38  ;;  %v3873_v60 = vld [vmem:[#allocation88_spill] sm:$0xff] }
 0x1b4   : > { %v3473_v62 = vadd.f32 %v1478_v61, %v1372_v3  ;;  %v1374_v4 = vpop.f32.mrb[2].mxu1  ;;  %v1480_v5 = vpop.f32.mrb[2].mxu0  ;;  %v3875_v61 = vld [vmem:[#allocation90_spill] sm:$0xff] }
 0x1b5   : > { %v2211_v6 = vadd.f32 %v1480_v5, %v1374_v4  ;;  %v1376_v7 = vpop.f32.mrb[3].mxu1  ;;  %v1482_v56 = vpop.f32.mrb[3].mxu0  ;;  %v1500_v34 = vrot.slane %v2209_v2, 1  ;;  %1824 = vmatpush1.bf16.msra.mxu1 %v2190_v36  ;;  %v3876_v4 = vld [vmem:[#allocation89_spill] sm:$0xff] }
 0x1b6   : > { %v3475_v57 = vadd.f32 %v1482_v56, %v1376_v7  ;;  %v1527_v13 = vrot.slane %v3473_v62, 1  ;;  %1825 = vmatprep.subr.bf16.mxu1 %v2293_v59  ;;  %v2192_v5 = vcombine.low %v3876_v4, %v3875_v61  ;;  %v3878_v7 = vld [vmem:[#allocation91_spill] sm:$0xff] }
 0x1b7   : > { %v1501_v8 = vrot.slane %v2211_v6, 1 }
 0x1b8   : > { %v1528_v26 = vrot.slane %v3475_v57, 1  ;;  %v1574_v15 = vrot.slane %v3475_v57, 2 }
 0x1b9   : > { %v1502_v31 = vsel %vm1499_vm6, %v1500_v34, %v1501_v8  ;;  %v3879_v34 = vld [vmem:[#allocation94_spill] sm:$0xff] }
 0x1ba   : > { %v1486_v9 = vpop.f32.mrb[4].mxu0  ;;  %1507 = vrot.lane.b32.xlu0 %v1502_v31, %s2294_s24  ;;  %v1380_v35 = vpop.f32.mrb[4].mxu1  ;;  %v1529_v51 = vsel %vm1499_vm6, %v1527_v13, %v1528_v26 }
 0x1bb   : > { %v2213_v54 = vadd.f32 %v1486_v9, %v1380_v35  ;;  %v1382_v55 = vpop.f32.mrb[5].mxu1  ;;  %v1488_v28 = vpop.f32.mrb[5].mxu0  ;;  %v3881_v9 = vld [vmem:[#allocation96_spill] sm:$0xff]  ;;  %v3882_v35 = vld [vmem:[#allocation95_spill] sm:$0xff] }
 0x1bc   : > { %v3479_v29 = vadd.f32 %v1488_v28, %v1382_v55  ;;  %v1384_v30 = vpop.f32.mrb[6].mxu1  ;;  %v1490_v32 = vpop.f32.mrb[6].mxu0  ;;  %v3883_v55 = vld [vmem:[#allocation98_spill] sm:$0xff]  ;;  %v3884_v28 = vld [vmem:[#allocation97_spill] sm:$0xff] }
 0x1bd   : > { %v1503_v33 = vrot.slane %v2213_v54, 1  ;;  %v2215_v10 = vadd.f32 %v1490_v32, %v1384_v30  ;;  %v1386_v11 = vpop.f32.mrb[7].mxu1  ;;  %v1492_v52 = vpop.f32.mrb[7].mxu0  ;;  %v2196_v30 = vcombine.low %v3884_v28, %v3883_v55  ;;  %v3885_v32 = vld [vmem:[#allocation100_spill] sm:$0xff] }
 0x1be   : > { %v3481_v53 = vadd.f32 %v1492_v52, %v1386_v11  ;;  %v1530_v14 = vrot.slane %v3479_v29, 1  ;;  %v1575_v49 = vrot.slane %v3479_v29, 2  ;;  %v3887_v11 = vld [vmem:[#allocation102_spill] sm:$0xff]  ;;  %v3888_v52 = vld [vmem:[#allocation101_spill] sm:$0xff] }
 0x1bf   : > { %v1505_v27 = vrot.slane %v2215_v10, 1  ;;  %v1504_v12 = vsel %vm1499_vm6, %v1501_v8, %v1503_v33  ;;  %v3880_v8 = vld [vmem:[#allocation93_spill] sm:$0xff] }
 0x1c0   : > { %1509 = vrot.lane.b32.xlu0 %v1504_v12, %s2294_s24  ;;  %v1532_v48 = vrot.slane %v3481_v53, 1  ;;  %v1531_v16 = vsel %vm1499_vm6, %v1528_v26, %v1530_v14  ;;  %v1577_v17 = vrot.slane %v3481_v53, 2  ;;  %v1576_v46 = vsel %vm1554_vm7, %v1574_v15, %v1575_v49  ;;  %v3890_v12 = vld [vmem:[#allocation103_spill] sm:$0xff] }
 0x1c1   : > { %v1506_v50 = vsel %vm1499_vm6, %v1503_v33, %v1505_v27  ;;  %v2194_v31 = vcombine.low %v3880_v8, %v3879_v34  ;;  %v3886_v33 = vld [vmem:[#allocation99_spill] sm:$0xff]  ;;  %v2198_v26 = vcombine.low %v3888_v52, %v3887_v11  ;;  %v3894_v34 = vld [vmem:[#allocation108_spill] sm:$0xff] }
 0x1c2   : > { %1511 = vrot.lane.b32.xlu1 %v1506_v50, %s2294_s24  ;;  %v1533_v63 = vsel %vm1499_vm6, %v1530_v14, %v1532_v48  ;;  %v1578_v47 = vsel %vm1554_vm7, %v1575_v49, %v1577_v17  ;;  %v3891_v50 = vld [vmem:[#allocation106_spill] sm:$0xff]  ;;  %v3895_v8 = vld [vmem:[#allocation107_spill] sm:$0xff] }
 0x1c4   : > { %1534 = vrot.lane.b32.xlu0 %v1529_v51, %s2294_s24  ;;  %v3892_v51 = vld [vmem:[#allocation105_spill] sm:$0xff] }
 0x1c5   : > { %v2200_v14 = vcombine.low %v3892_v51, %v3891_v50 }
 0x1c6   : > { %1519 = vrot.lane.b32.xlu1 %v1505_v27, %s2294_s24  ;;  %v3889_v27 = vld [vmem:[#allocation104_spill] sm:$0xff] }
 0x1c7   : > { %v2199_v13 = vcombine.low %v3890_v12, %v3889_v27 }
 0x1c8   : > { %1579 = vrot.lane.b32.xlu0 %v1574_v15, %s2295_s25 }
 0x1ca   : > { %1536 = vrot.lane.b32.xlu1 %v1531_v16, %s2294_s24 }
 0x1cc   : > { %1538 = vrot.lane.b32.xlu0 %v1533_v63, %s2294_s24 }
 0x1ce   : > { %1581 = vrot.lane.b32.xlu1 %v1576_v46, %s2295_s25 }
 0x1d0   : > { %1583 = vrot.lane.b32.xlu0 %v1578_v47, %s2295_s25 }
 0x1d2   : > { %1540 = vrot.lane.b32.xlu1 %v1532_v48, %s2294_s24 }
 0x1d6   : > { %1585 = vrot.lane.b32.xlu1 %v1577_v17, %s2295_s25 }
 0x22c   : > { %v1508_v18 = vpop.permute.xlu0 %1507 }
 0x22d   : > { %v3508_v19 = vadd.f32 %v2209_v2, %v1508_v18  ;;  %v3874_v2 = vld [vmem:[#allocation87_spill] sm:$0xff] }
 0x22e   : > { %v2191_v3 = vcombine.low %v3874_v2, %v3873_v60  ;;  %v3893_v60 = vld [vmem:[#allocation111_spill] sm:$0xff] }
 0x22f   : > { %v1555_v21 = vrot.slane %v3508_v19, 2 }
 0x230   : > { %1826 = vmatpush1.bf16.msra.mxu1 %v2191_v3 }
 0x231   : > { %1827 = vmatprep.subr.bf16.mxu1 %v2293_v59 }
 0x232   : > { %v1510_v44 = vpop.permute.xlu0 %1509 }
 0x233   : > { %v3510_v45 = vadd.f32 %v2211_v6, %v1510_v44  ;;  %v3877_v6 = vld [vmem:[#allocation92_spill] sm:$0xff] }
 0x234   : > { %v1512_v20 = vpop.permute.xlu1 %1511  ;;  %1828 = vmatpush1.bf16.msra.mxu1 %v2192_v5  ;;  %v2193_v56 = vcombine.low %v3878_v7, %v3877_v6 }
 0x235   : > { %v1556_v42 = vrot.slane %v3510_v45, 2  ;;  %v3514_v43 = vadd.f32 %v2213_v54, %v1512_v20  ;;  %1829 = vmatprep.subr.bf16.mxu1 %v2293_v59  ;;  %v2195_v54 = vcombine.low %v3882_v35, %v3881_v9 }
 0x236   : > { %v1535_v15 = vpop.permute.xlu0 %1534 }
 0x237   : > { %v1558_v22 = vrot.slane %v3514_v43, 2  ;;  %v1557_v23 = vsel %vm1554_vm7, %v1555_v21, %v1556_v42  ;;  %v1546_v18 = vadd.f32 %v3473_v62, %v1535_v15 }
 0x238   : > { %v1520_v40 = vpop.permute.xlu1 %1519  ;;  %1562 = vrot.lane.b32.xlu0 %v1557_v23, %s2295_s25  ;;  %1830 = vmatpush1.bf16.msra.mxu1 %v2193_v56 }
 0x239   : > { %v1522_v41 = vadd.f32 %v2215_v10, %v1520_v40  ;;  %v1559_v0 = vsel %vm1554_vm7, %v1556_v42, %v1558_v22  ;;  %1831 = vmatprep.subr.bf16.mxu1 %v2293_v59  ;;  %v2197_v10 = vcombine.low %v3886_v33, %v3885_v32  ;;  %v3896_v32 = vld [vmem:[#allocation110_spill] sm:$0xff]  ;;  %v3897_v33 = vld [vmem:[#allocation109_spill] sm:$0xff] }
 0x23a   : > { %1564 = vrot.lane.b32.xlu1 %v1559_v0, %s2295_s25  ;;  %v1580_v49 = vpop.permute.xlu0 %1579 }
 0x23b   : > { %v1560_v1 = vrot.slane %v1522_v41, 2  ;;  %v1591_v21 = vadd.f32 %v1580_v49, %v1546_v18  ;;  %v582_v41 = vlaneseq }
 0x23c   : > { %1832 = vmatpush1.bf16.msra.mxu1 %v2194_v31  ;;  %v1537_v48 = vpop.permute.xlu1 %1536 }
 0x23d   : > { %v1561_v37 = vsel %vm1554_vm7, %v1558_v22, %v1560_v1  ;;  %1833 = vmatprep.subr.bf16.mxu1 %v2293_v59  ;;  %v1547_v46 = vadd.f32 %v3475_v57, %v1537_v48  ;;  %v1600_v0 = vrot.slane %v1591_v21, 4  ;;  %v583_v62 = vshrl.u32 %v582_v41, 7 }
 0x23e   : > { %1566 = vrot.lane.b32.xlu0 %v1561_v37, %s2295_s25  ;;  %v1539_v17 = vpop.permute.xlu0 %1538 }
 0x23f   : > { %v1548_v44 = vadd.f32 %v3479_v29, %v1539_v17  ;;  %v585_v3 = vadd.s32 16, %v583_v62  ;;  %v1625_v31 = vadd.s32 4294967293, %v583_v62 }
 0x240   : > { %1834 = vmatpush1.bf16.msra.mxu1 %v2195_v54  ;;  %v1582_v16 = vpop.permute.xlu1 %1581 }
 0x241   : > { %1835 = vmatprep.subr.bf16.mxu1 %v2293_v59  ;;  %v1592_v20 = vadd.f32 %v1582_v16, %v1547_v46  ;;  %v1627_v9 = vadd.s32 4294967293, %v585_v3  ;;  %vm1628_vm9 = vcmp.ge.s32.totalorder %v1625_v31, 0 }
 0x242   : > { %v1584_v47 = vpop.permute.xlu0 %1583 }
 0x243   : > { %v1593_v42 = vadd.f32 %v1584_v47, %v1548_v44  ;;  %v1601_v23 = vrot.slane %v1592_v20, 4  ;;  %vm1633_vm10 = vcmp.lt.s32.totalorder %v1627_v9, 16 }
 0x244   : > { %1836 = vmatpush1.bf16.msra.mxu1 %v2196_v30  ;;  %v1541_v63 = vpop.permute.xlu1 %1540 }
 0x245   : > { %1837 = vmatprep.subr.bf16.mxu1 %v2293_v59  ;;  %v1549_v40 = vadd.f32 %v3481_v53, %v1541_v63  ;;  %v1603_v1 = vrot.slane %v1593_v42, 4  ;;  %v1602_v24 = vsel %vm1599_vm8, %v1600_v0, %v1601_v23 }
 0x247   : > { %v1604_v36 = vsel %vm1599_vm8, %v1601_v23, %v1603_v1 }
 0x248   : > { %1838 = vmatpush1.bf16.msra.mxu1 %v2197_v10  ;;  %v1586_v22 = vpop.permute.xlu1 %1585  ;;  %v2202_v10 = vcombine.low %v3897_v33, %v3896_v32 }
 0x249   : > { %1839 = vmatprep.subr.bf16.mxu1 %v2293_v59  ;;  %v1594_v37 = vadd.f32 %v1586_v22, %v1549_v40 }
 0x24b   : > { %v1605_v39 = vrot.slane %v1594_v37, 4 }
 0x24c   : > { %1840 = vmatpush1.bf16.msra.mxu1 %v2198_v26 }
 0x24d   : > { %1841 = vmatprep.subr.bf16.mxu1 %v2293_v59  ;;  %v1606_v6 = vsel %vm1599_vm8, %v1603_v1, %v1605_v39 }
 0x250   : > { %1842 = vmatpush1.bf16.msra.mxu1 %v2199_v13 }
 0x251   : > { %1843 = vmatprep.subr.bf16.mxu1 %v2293_v59 }
 0x254   : > { %1844 = vmatpush1.bf16.msra.mxu1 %v2200_v14 }
 0x255   : > { %1845 = vmatprep.subr.bf16.mxu1 %v2293_v59 }
 0x2aa   : > { %v1563_v58 = vpop.permute.xlu0 %1562 }
 0x2ab   : > { %v1571_v57 = vadd.f32 %v1563_v58, %v3508_v19 }
 0x2ac   : > { %v1565_v25 = vpop.permute.xlu1 %1564 }
 0x2ad   : > { %v1610_v29 = vadd.f32 %v1602_v24, %v1571_v57  ;;  %v1572_v38 = vadd.f32 %v1565_v25, %v3510_v45  ;;  %v2201_v45 = vcombine.low %v3895_v8, %v3894_v34 }
 0x2af   : > { %v1619_v53 = vadd.f32 %v3893_v60, %v1610_v29  ;;  %v1611_v2 = vadd.f32 %v1604_v36, %v1572_v38  ;;  %1846 = vmatpush1.bf16.msra.mxu1 %v2201_v45 }
 0x2b0   : > { %v1567_v61 = vpop.permute.xlu0 %1566  ;;  %1847 = vmatprep.subr.bf16.mxu1 %v2293_v59 }
 0x2b1   : > { %v1620_v4 = vadd.f32 %v3893_v60, %v1611_v2  ;;  %v1573_v5 = vadd.f32 %v1567_v61, %v3514_v43  ;;  %v1622_v19 = vmax.f32 %v1619_v53, 0.0 }
 0x2b3   : > { %v1623_v7 = vmax.f32 %v1620_v4, 0.0  ;;  %v1612_v56 = vadd.f32 %v1606_v6, %v1573_v5  ;;  %v1646_v55 = vrot.slane %v1622_v19, 2  ;;  %1848 = vmatpush1.bf16.msra.mxu1 %v2202_v10  ;;  %v3898_v6 = vld [vmem:[#allocation112_spill] sm:$0xff] }
 0x2b5   : > { %v1647_v35 = vrot.slane %v1623_v7, 2  ;;  %v1621_v54 = vadd.f32 %v3893_v60, %v1612_v56 }
 0x2b7   : > { %v1624_v28 = vmax.f32 %v1621_v54, 0.0  ;;  %v1648_v43 = vsel %vm1554_vm7, %v1646_v55, %v1647_v35 }
 0x2b8   : > { %v1654_v11 = vsel %vm1628_vm9, %v1648_v43, 0.0 }
 0x2b9   : > { %v1649_v30 = vrot.slane %v1624_v28, 2 }
 0x2bb   : > { %v1650_v52 = vsel %vm1554_vm7, %v1647_v35, %v1649_v30  ;;  %v1656_v26 = vsel %vm1633_vm10, %v1649_v30, 0.0 }
 0x2bc   : > { %v1657_v27 = vpack.c.bf16 %v1650_v52, %v1654_v11  ;;  %v1658_v12 = vpack.c.bf16 %v1656_v26, %v1656_v26 }
 0x2be   : > { %v1677_v13 = vrot.slane %v1657_v27, 1  ;;  %v1678_v50 = vrot.slane %v1658_v12, 1  ;;  %v1661_v51 = vshrl.u32 %v1657_v27, 16  ;;  %v1663_v59 = vshll.u32 %v1657_v27, 16 }
 0x2bf   : > { %v1668_v14 = vshll.u32 %v1658_v12, 16  ;;  %v1686_v15 = vshrl.u32 %v1658_v12, 16  ;;  %v1709_v1 = vrot.slane %v1657_v27, 3  ;;  %v1710_v37 = vrot.slane %v1658_v12, 3 }
 0x2c0   : > { %v1679_v48 = vsel %vm1499_vm6, %v1677_v13, %v1678_v50  ;;  %v1699_v49 = vrot.slane %v1661_v51, 2  ;;  %v1700_v16 = vrot.slane %v1663_v59, 3  ;;  %v1665_v17 = vrot.slane %v1663_v59, 1 }
 0x2c1   : > { %1680 = vrot.lane.b32.xlu1 %v1679_v48, %s2295_s25  ;;  %v1702_v63 = vrot.slane %v1686_v15, 2  ;;  %v1703_v46 = vrot.slane %v1668_v14, 3  ;;  %v1670_v47 = vrot.slane %v1668_v14, 1  ;;  %v1683_v20 = vrot.slane %v1661_v51, 1 }
 0x2c2   : > { %v1701_v18 = vor.u32 %v1700_v16, %v1699_v49  ;;  %v1666_v44 = vor.u32 %v1665_v17, %v1661_v51  ;;  %v1684_v21 = vrot.slane %v1663_v59, 2  ;;  %v1688_v22 = vrot.slane %v1686_v15, 1 }
 0x2c3   : > { %v1704_v42 = vor.u32 %v1703_v46, %v1702_v63  ;;  %v1689_v23 = vrot.slane %v1668_v14, 2  ;;  %v1711_v24 = vsel %vm1708_vm14, %v1709_v1, %v1710_v37  ;;  %v1695_v25 = vrot.slane %v1657_v27, 2 }
 0x2c4   : > { %v1671_v40 = vsel %vm1659_vm12, %v1666_v44, %v1670_v47  ;;  %v1685_v41 = vor.u32 %v1684_v21, %v1683_v20  ;;  %v1696_v29 = vrot.slane %v1658_v12, 2 }
 0x2c5   : > { %v1705_v0 = vsel %vm1698_vm11, %v1701_v18, %v1704_v42  ;;  %1672 = vrot.lane.b32.xlu1 %v1671_v40, %s2296_s27  ;;  %v1690_v58 = vor.u32 %v1689_v23, %v1688_v22 }
 0x2c6   : > { %1706 = vrot.lane.b32.xlu0 %v1705_v0, %s2296_s27  ;;  %v1697_v60 = vsel %vm1554_vm7, %v1695_v25, %v1696_v29 }
 0x2c7   : > { %v1691_v57 = vsel %vm1682_vm13, %v1685_v41, %v1690_v58 }
 0x2c9   : > { %1692 = vrot.lane.b32.xlu1 %v1691_v57, %s2294_s24 }
 0x2ca   : > { %1712 = vrot.lane.b32.xlu0 %v1711_v24, %s2295_s25 }
 0x333   : > { %v1681_v62 = vpop.permute.xlu1 %1680 }
 0x337   : > { %v1673_v38 = vpop.permute.xlu1 %1672 }
 0x338   : > { %v1707_v39 = vpop.permute.xlu0 %1706  ;;  %v1716_v36 = vsel %vm1714_vm15, %v1657_v27, %v1673_v38 }
 0x339   : > { %v1719_v53 = vsel %vm1717_vm0, %v1716_v36, %v1681_v62  ;;  %v1726_v3 = vsel %vm1714_vm15, %v1697_v60, %v1707_v39 }
 0x33b   : > { %v1693_v2 = vpop.permute.xlu1 %1692 }
 0x33c   : > { %v1713_v61 = vpop.permute.xlu0 %1712  ;;  %v1722_v4 = vsel %vm1720_vm1, %v1719_v53, %v1693_v2 }
 0x33d   : > { %v1728_v5 = vsel %vm1717_vm0, %v1726_v3, %v1713_v61 }
 0x33e   : > { %2203 = vmatprep.mubr.msk.bf16.mxu1 %vm1720_vm1, %v1728_v5 }
 0x33f   : > { %1854 = vmatmul.mubr.bf16.vlgmr.msra.gmra.mrb[8].mxu1 %v1722_v4 }
 0x412   : > { %v1855_v19 = vpop.f32.mrb[8].mxu1 }
 0x413   : > { %v1856_v7 = vadd.f32 %v3898_v6, %v1855_v19  ;;  %v1857_v56 = vpop.f32.mrb[9].mxu1 }
 0x414   : > { %v1858_v34 = vpop.f32.mrb[10].mxu1 }
 0x415   : > { %v1860_v8 = vpop.f32.mrb[11].mxu1  ;;  %1862 = vxpose.xlu0.b32.start [1/2] (short) (narrow) %v1856_v7, 24  ;;  %v1859_v45 = vadd.f32 %v3898_v6, %v1858_v34 }
 0x419   : > { %1863 = vxpose.xlu0.b32.end [2/2] (short) (narrow) %v1859_v45, 24 }
 0x495   : > { %v1878_v31 = vpop.trf.xlu0 }
 0x496   : > { %1895 = vst.msk [vmem:[%s2442_s16] sm:$0xff] %vm1894_vm2, %v1878_v31 }
 0x499   : > { %v1879_v9 = vpop.trf.xlu0 }
 0x49a   : > { %1896 = vst.msk [vmem:[%s2442_s16 + $0x8] sm:$0xff] %vm1894_vm2, %v1879_v9 }
 0x49d   : > { %v1880_v35 = vpop.trf.xlu0 }
 0x49e   : > { %1898 = vst.msk [vmem:[%s2442_s16 + $0x10] sm:$0xf] %vm1897_vm3, %v1880_v35 }
 0x49f PF: > { %s15_s20 = sadd.s32 1, %s2289_s20   ;;  %s3899_s18 = smov %s2285_s19 }
 0x4a0   : > { %p12_p5 = scmp.ge.s32.totalorder %s15_s20, 4   ;;  %s3900_s19 = smov %s3902_s21 }
 0x4a2   :  { %14 = sbr.rel (!%p12_p5) target bundleno = 2 (0x2), region = 163 }
 0x4a9   :  { %1923 = vsyncmov [#allocation3] }
 0x4ac   :  { %s1924_s28 = vpop.sfrf %1923 }
 0x4ad   :  { %p2206_p6 = scmp.ne.s32.totalorder %s1924_s28, 0 }
 0x4af   :  { %1928 = shalt.err (%p2206_p6)  }
 0x4b0   :  { %1930 = vsyncmov [#allocation3 + $0x1] }
 0x4b3   :  { %s1931_s29 = vpop.sfrf %1930 }
 0x4b4   :  { %p2207_p7 = scmp.ne.s32.totalorder %s1931_s29, 0 }
 0x4b6   :  { %1935 = shalt.err (%p2207_p7)  }

</bundles_post_ra>
